<compile_context>
chip_gen: v5e
topology: v5e:2x2
jax: 0.10.0
libtpu: 0.0.40
codegen_flags: <defaults>
</compile_context>

<pallas_src>
import functools

import jax
import jax.numpy as jnp
import numpy as np
from jax.experimental import pallas as pl
from jax.experimental.pallas import tpu as pltpu


def _dtcn_shifts(kernel_list):
    """Distinct time shifts used by any (branch, tap) pair."""
    shifts = set()
    for k in kernel_list:
        start = (k - 1) // 2
        for j in range(k):
            shifts.add(start - j)
    return tuple(sorted(shifts))


def _pack_dtcn_weights(params, kernel_list, C):
    """Pack all branches/taps/(filter,gate) into one weight-on-left matrix.

    Returns (shifts, wT (2*Cout, S*C), bT (2*Cout, 1)).
    """
    shifts = _dtcn_shifts(kernel_list)
    pos = {s: i for i, s in enumerate(shifts)}
    Cout = sum(int(params[f"w{i}"].shape[2]) for i in range(len(kernel_list)))
    wpack = jnp.zeros((len(shifts) * C, 2 * Cout), jnp.float32)
    bpack = jnp.zeros((2 * Cout, 1), jnp.float32)
    col = 0
    for i, k in enumerate(kernel_list):
        W = params[f"w{i}"].astype(jnp.float32)      # (2, C, Cs, k) [0]=filter [1]=gate
        b = params[f"b{i}"].astype(jnp.float32)      # (2, Cs)
        Cs = int(W.shape[2])
        start = (k - 1) // 2
        for j in range(k):
            r = pos[start - j]                       # row block = time shift
            wpack = wpack.at[r * C:(r + 1) * C, col:col + Cs].set(W[0, :, :, j])
            wpack = wpack.at[r * C:(r + 1) * C,
                             Cout + col:Cout + col + Cs].set(W[1, :, :, j])
        bpack = bpack.at[col:col + Cs, 0].set(b[0])
        bpack = bpack.at[Cout + col:Cout + col + Cs, 0].set(b[1])
        col += Cs
    return shifts, wpack.T, bpack                    # weight-on-left


def _roll_lanes(x, shift):
    """roll along the last (lane) axis with a static shift: slice + concat."""
    m = x.shape[-1]
    shift = shift % m
    if shift == 0:
        return x
    return jnp.concatenate([x[..., m - shift:], x[..., :m - shift]], axis=-1)


def _make_st_kernel(shifts, dvals, T):
    """Per-step kernel: fused dtcn -> gcn -> residual, NCHW lane-dense output + BN stats."""

    def kernel(x_ref, coef_ref, tmask_ref, wT_ref, bT_ref, wm_ref, bm_ref,
               y_ref, stats_ref):
        NB, C, M = x_ref.shape
        tmask = tmask_ref[...]                       # (S, M) 0/1 time-validity per shift
        coefs = coef_ref[...]                        # (NB, 2V-1, 2, M) diffusion coeffs
        wT = wT_ref[...]                             # (2C, S*C)
        bT = bT_ref[...]                             # (2C, 1)
        wm = wm_ref[...]                             # (C, 3C) hop-major mixing weight
        bm = bm_ref[...]                             # (C, 1)

        s_tot = jnp.zeros((C, 1), jnp.float32)
        ss_tot = jnp.zeros((C, 1), jnp.float32)

        for bi in range(NB):                         # batches folded into this step
            x2d = x_ref[bi]                          # (C, V*T) lane-dense NCHW slab

            # ---- dtcn: all branches/taps/gates in ONE matmul ----------------
            # ConvTranspose2d(kernel=(1,k)) + center slice ==
            #   out[o, v, t] = sum_{c,j} x[c, v, t + start - j] * W[c, o, j] + b[o]
            # Build the shift stack with lane rolls + 0/1 masks (no zero pads).
            parts = []
            for si, s in enumerate(shifts):
                if s == 0:
                    parts.append(x2d)
                else:
                    parts.append(_roll_lanes(x2d, -s) * tmask[si:si + 1, :])
            xstack = jnp.concatenate(parts, axis=0)                  # (S*C, M)
            pre = jnp.dot(wT, xstack, preferred_element_type=jnp.float32) + bT
            x_dt = jnp.tanh(pre[:C]) * jax.nn.sigmoid(pre[C:])        # (C, M)

            # ---- gcn: both diffusion hops via shared lane rolls --------------
            # x1[c, w*T+t] = sum_v A[v,w]   x_dt[c, v*T+t]
            # x2[c, w*T+t] = sum_v A^2[v,w] x_dt[c, v*T+t]
            # roll by d*T aligns source node v = w - d for every w at once; the
            # per-lane coefficient tables (A / A@A, zero outside the graph) are
            # precomputed wrapper-side.
            x1 = jnp.zeros((C, M), jnp.float32)
            x2 = jnp.zeros((C, M), jnp.float32)
            for di, d in enumerate(dvals):
                r = x_dt if d == 0 else _roll_lanes(x_dt, d * T)
                cf = coefs[bi, di]                                    # (2, M)
                x1 = x1 + r * cf[0:1, :]
                x2 = x2 + r * cf[1:2, :]
            h = jnp.concatenate([x_dt, x1, x2], axis=0)               # (3C, M) hop-major
            mixed = jnp.dot(wm, h, preferred_element_type=jnp.float32) + bm
            # TODO(synk): F.dropout(p, training=True) uses a torch RNG stream with
            # no deterministic Pallas equivalent; treated as identity (p = 0).

            # ---- residual, lane-dense store, BN partial stats -----------------
            y = mixed + x2d                                           # (C, M)
            y_ref[bi] = y
            s_tot = s_tot + jnp.sum(y, axis=1, keepdims=True)
            ss_tot = ss_tot + jnp.sum(y * y, axis=1, keepdims=True)

        stats_ref[0] = jnp.concatenate([s_tot, ss_tot], axis=0)       # (2C, 1)

    return kernel


def _bn_apply_kernel(y_ref, scale_ref, shift_ref, out_ref):
    """BatchNorm2d apply pass: pure streaming multiply-add on lane-dense tiles."""
    out_ref[...] = y_ref[...] * scale_ref[...] + shift_ref[...]


@functools.partial(jax.jit, static_argnums=(3,))
def de_stblock_forward(x_nchw, adj, params, kernel_list):
    N, C, V, T = x_nchw.shape
    M = V * T
    x2d = x_nchw.reshape(N, C, M).astype(jnp.float32)        # free reshape, stays NCHW

    # >= 2 grid steps (v7x has 2 TensorCores); remaining batch folded per step
    # to amortize the ~0.35us per-step overhead and reuse resident weights.
    n_steps = 2 if (N >= 2 and N % 2 == 0) else 1
    NB = N // n_steps

    shifts, wT, bT = _pack_dtcn_weights(params, kernel_list, C)
    S = len(shifts)
    wm = params["wm"].astype(jnp.float32)                    # (C, 3C) hop-major already
    bm = params["bm"].astype(jnp.float32).reshape(C, 1)

    # Time-validity masks for every distinct shift (shared by batch & channels).
    t_idx = np.arange(M) % T
    tmask = jnp.asarray(np.stack(
        [((t_idx + s >= 0) & (t_idx + s < T)).astype(np.float32) for s in shifts]))  # (S, M)

    # Graph-diffusion lane coefficients: hops [A, A@A] precomputed per batch.
    adj_f = adj.astype(jnp.float32)
    A2 = jnp.einsum('nuv,nvw->nuw', adj_f, adj_f)
    Apow = jnp.stack([adj_f, A2], axis=1)                    # (N, 2, V, V)  [n,h,v,w]
    dvals = tuple(range(-(V - 1), V))
    D = len(dvals)
    w_idx = np.arange(V)
    v_src = w_idx[None, :] - np.asarray(dvals)[:, None]      # (D, V): source v = w - d
    valid = ((v_src >= 0) & (v_src < V)).astype(np.float32)
    v_cl = np.clip(v_src, 0, V - 1)
    coefw = Apow[:, :, v_cl, w_idx[None, :]] * valid[None, None]   # (N, 2, D, V)
    coef = jnp.repeat(coefw, T, axis=-1)                     # (N, 2, D, M)
    coef = jnp.transpose(coef, (0, 2, 1, 3))                 # (N, D, 2, M)

    def rep(shape):
        return pl.BlockSpec(shape, lambda n: (0,) * len(shape))

    yraw, stats = pl.pallas_call(
        _make_st_kernel(shifts, dvals, T),
        out_shape=(jax.ShapeDtypeStruct((N, C, M), jnp.float32),
                   jax.ShapeDtypeStruct((n_steps, 2 * C, 1), jnp.float32)),
        grid=(n_steps,),
        in_specs=[
            pl.BlockSpec((NB, C, M), lambda n: (n, 0, 0)),
            pl.BlockSpec((NB, D, 2, M), lambda n: (n, 0, 0, 0)),
            rep((S, M)),
            rep((2 * C, S * C)),
            rep((2 * C, 1)),
            rep((C, 3 * C)),
            rep((C, 1)),
        ],
        out_specs=(
            pl.BlockSpec((NB, C, M), lambda n: (n, 0, 0)),
            pl.BlockSpec((1, 2 * C, 1), lambda n: (n, 0, 0)),
        ),
        compiler_params=pltpu.CompilerParams(dimension_semantics=("parallel",)),
    )(x2d, coef, tmask, wT, bT, wm, bm)

    # BatchNorm2d (training-mode batch stats): C-sized finalize in plain JAX,
    # then a single aliased multiply-add Pallas pass.
    # TODO(synk): running_mean/running_var buffer updates of BatchNorm2d are not produced.
    tot = jnp.sum(stats, axis=0)[:, 0]                       # (2C,)
    count = float(N * M)
    mean = tot[:C] / count
    var = tot[C:] / count - mean * mean                      # biased, like torch
    scale = params["gamma"].astype(jnp.float32) * jax.lax.rsqrt(var + 1e-5)
    shift = params["beta"].astype(jnp.float32) - mean * scale

    out = pl.pallas_call(
        _bn_apply_kernel,
        out_shape=jax.ShapeDtypeStruct((N, C, M), jnp.float32),
        grid=(n_steps,),
        in_specs=[
            pl.BlockSpec((NB, C, M), lambda n: (n, 0, 0)),
            rep((C, 1)),
            rep((C, 1)),
        ],
        out_specs=pl.BlockSpec((NB, C, M), lambda n: (n, 0, 0)),
        input_output_aliases={0: 0},
        compiler_params=pltpu.CompilerParams(dimension_semantics=("parallel",)),
    )(yraw, scale.reshape(C, 1), shift.reshape(C, 1))

    return out.reshape(N, C, V, T)                           # free split of the last dim


# ---------------- pure-JAX reference (scatter formulation, NCHW) ----------------
def de_stblock_reference(x, adj, params, kernel_list):
    N, C, V, T = x.shape
    branches = []
    for i, k in enumerate(kernel_list):
        W = params[f"w{i}"]                      # (2, C, Cs, k)
        b = params[f"b{i}"]                      # (2, Cs)
        Cs = W.shape[2]
        start = (k - 1) // 2

        def conv_t(w2, bias):
            y = jnp.zeros((N, Cs, V, T + k - 1), jnp.float32)
            for j in range(k):
                y = y.at[:, :, :, j:j + T].add(
                    jnp.einsum('ncvt,co->novt', x, w2[:, :, j]))
            return y + bias[None, :, None, None]

        f = jnp.tanh(conv_t(W[0], b[0]))
        g = jax.nn.sigmoid(conv_t(W[1], b[1]))
        branches.append((f * g)[:, :, :, start:start + T])
    x_dt = jnp.concatenate(branches, axis=1)
    x1 = jnp.einsum('ncvt,nvw->ncwt', x_dt, adj)
    x2 = jnp.einsum('ncvt,nvw->ncwt', x1, adj)
    h = jnp.concatenate([x_dt, x1, x2], axis=1)
    out = jnp.einsum('oc,ncvt->novt', params["wm"], h) + params["bm"][None, :, None, None]
    y = out + x
    mean = jnp.mean(y, axis=(0, 2, 3), keepdims=True)
    var = jnp.mean((y - mean) ** 2, axis=(0, 2, 3), keepdims=True)
    return ((y - mean) * jax.lax.rsqrt(var + 1e-5)
            * params["gamma"][None, :, None, None]
            + params["beta"][None, :, None, None])


if __name__ == "__main__":
    hidden, kernel_list = 32, (2, 3, 6, 7)
    N, V, T = 2, 8, 16
    Cs = hidden // len(kernel_list)

    key = jax.random.PRNGKey(0)
    ks = jax.random.split(key, 16)
    params = {}
    for i, k in enumerate(kernel_list):
        params[f"w{i}"] = 0.2 * jax.random.normal(ks[2 * i], (2, hidden, Cs, k), jnp.float32)
        params[f"b{i}"] = 0.1 * jax.random.normal(ks[2 * i + 1], (2, Cs), jnp.float32)
    params["wm"] = 0.2 * jax.random.normal(ks[8], (hidden, 3 * hidden), jnp.float32)
    params["bm"] = 0.1 * jax.random.normal(ks[9], (hidden,), jnp.float32)
    params["gamma"] = 1.0 + 0.1 * jax.random.normal(ks[10], (hidden,), jnp.float32)
    params["beta"] = 0.1 * jax.random.normal(ks[11], (hidden,), jnp.float32)

    X = jax.random.normal(ks[12], (N, hidden, V, T), jnp.float32)
    adj = jax.random.uniform(ks[13], (N, V, V), jnp.float32)
    adj = adj / jnp.sum(adj, axis=-1, keepdims=True)

    out = de_stblock_forward(X, adj, params, kernel_list)
    out = jax.block_until_ready(out)

    ref = de_stblock_reference(X, adj, params, kernel_list)
    assert out.shape == ref.shape == (N, hidden, V, T)
    np.testing.assert_allclose(np.asarray(out), np.asarray(ref), rtol=2e-3, atol=2e-3)
    print("KERNEL_OK")
</pallas_src>

<mosaic_0001>
module attributes {stable_mosaic.version = 11 : i64} {
  func.func @kernel(%arg0: i32, %arg1: memref<1x32x128xf32, #tpu.memory_space<vmem>>, %arg2: memref<1x15x2x128xf32, #tpu.memory_space<vmem>>, %arg3: memref<7x128xf32, #tpu.memory_space<vmem>>, %arg4: memref<64x224xf32, #tpu.memory_space<vmem>>, %arg5: memref<64x1xf32, #tpu.memory_space<vmem>>, %arg6: memref<32x96xf32, #tpu.memory_space<vmem>>, %arg7: memref<32x1xf32, #tpu.memory_space<vmem>>, %arg8: memref<1x32x128xf32, #tpu.memory_space<vmem>>, %arg9: memref<1x64x1xf32, #tpu.memory_space<vmem>>) attributes {dimension_semantics = [#tpu.dimension_semantics<parallel>], iteration_bounds = array<i64: 2>, scalar_prefetch = 0 : i64, scratch_operands = 0 : i64, tpu.core_type = #tpu.core_type<tc>, window_params = [{transform_indices = @transform_0, window_bounds = array<i64: 1, 32, 128>}, {transform_indices = @transform_1, window_bounds = array<i64: 1, 15, 2, 128>}, {pipeline_mode = #tpu.pipeline_mode<synchronous>, transform_indices = @transform_2, window_bounds = array<i64: 7, 128>}, {pipeline_mode = #tpu.pipeline_mode<synchronous>, transform_indices = @transform_3, window_bounds = array<i64: 64, 224>}, {pipeline_mode = #tpu.pipeline_mode<synchronous>, transform_indices = @transform_4, window_bounds = array<i64: 64, 1>}, {pipeline_mode = #tpu.pipeline_mode<synchronous>, transform_indices = @transform_5, window_bounds = array<i64: 32, 96>}, {pipeline_mode = #tpu.pipeline_mode<synchronous>, transform_indices = @transform_6, window_bounds = array<i64: 32, 1>}, {transform_indices = @transform_7, window_bounds = array<i64: 1, 32, 128>}, {transform_indices = @transform_8, window_bounds = array<i64: 1, 64, 1>}]} {
    %c0 = arith.constant 0 : index
    %c0_0 = arith.constant 0 : index
    %0 = vector.load %arg3[%c0, %c0_0] : memref<7x128xf32, #tpu.memory_space<vmem>>, vector<7x128xf32>
    %c0_1 = arith.constant 0 : index
    %c0_2 = arith.constant 0 : index
    %c0_3 = arith.constant 0 : index
    %c0_4 = arith.constant 0 : index
    %1 = vector.load %arg2[%c0_1, %c0_2, %c0_3, %c0_4] : memref<1x15x2x128xf32, #tpu.memory_space<vmem>>, vector<1x15x2x128xf32>
    %c0_5 = arith.constant 0 : index
    %c0_6 = arith.constant 0 : index
    %2 = vector.load %arg4[%c0_5, %c0_6] : memref<64x224xf32, #tpu.memory_space<vmem>>, vector<64x224xf32>
    %c0_7 = arith.constant 0 : index
    %c0_8 = arith.constant 0 : index
    %3 = vector.load %arg5[%c0_7, %c0_8] : memref<64x1xf32, #tpu.memory_space<vmem>>, vector<64x1xf32>
    %c0_9 = arith.constant 0 : index
    %c0_10 = arith.constant 0 : index
    %4 = vector.load %arg6[%c0_9, %c0_10] : memref<32x96xf32, #tpu.memory_space<vmem>>, vector<32x96xf32>
    %c0_11 = arith.constant 0 : index
    %c0_12 = arith.constant 0 : index
    %5 = vector.load %arg7[%c0_11, %c0_12] : memref<32x1xf32, #tpu.memory_space<vmem>>, vector<32x1xf32>
    %cst = arith.constant 0.000000e+00 : f32
    %6 = vector.broadcast %cst : f32 to vector<32x1xf32>
    %cst_13 = arith.constant 0.000000e+00 : f32
    %7 = vector.broadcast %cst_13 : f32 to vector<32x1xf32>
    %c0_14 = arith.constant 0 : index
    %c0_15 = arith.constant 0 : index
    %c0_16 = arith.constant 0 : index
    %8 = vector.load %arg1[%c0_14, %c0_15, %c0_16] : memref<1x32x128xf32, #tpu.memory_space<vmem>>, vector<1x32x128xf32>
    %9 = vector.shape_cast %8 : vector<1x32x128xf32> to vector<32x128xf32>
    %10 = vector.extract_strided_slice %9 {offsets = [0, 125], sizes = [32, 3], strides = [1, 1]} : vector<32x128xf32> to vector<32x3xf32>
    %11 = vector.extract_strided_slice %9 {offsets = [0, 0], sizes = [32, 125], strides = [1, 1]} : vector<32x128xf32> to vector<32x125xf32>
    %12 = tpu.concatenate %10, %11 in 1 : vector<32x3xf32>, vector<32x125xf32> -> vector<32x128xf32>
    %13 = vector.extract_strided_slice %0 {offsets = [0, 0], sizes = [1, 128], strides = [1, 1]} : vector<7x128xf32> to vector<1x128xf32>
    %14 = vector.broadcast %13 : vector<1x128xf32> to vector<32x128xf32>
    %15 = arith.mulf %12, %14 : vector<32x128xf32>
    %16 = vector.extract_strided_slice %9 {offsets = [0, 126], sizes = [32, 2], strides = [1, 1]} : vector<32x128xf32> to vector<32x2xf32>
    %17 = vector.extract_strided_slice %9 {offsets = [0, 0], sizes = [32, 126], strides = [1, 1]} : vector<32x128xf32> to vector<32x126xf32>
    %18 = tpu.concatenate %16, %17 in 1 : vector<32x2xf32>, vector<32x126xf32> -> vector<32x128xf32>
    %19 = vector.extract_strided_slice %0 {offsets = [1, 0], sizes = [1, 128], strides = [1, 1]} : vector<7x128xf32> to vector<1x128xf32>
    %20 = vector.broadcast %19 : vector<1x128xf32> to vector<32x128xf32>
    %21 = arith.mulf %18, %20 : vector<32x128xf32>
    %22 = vector.extract_strided_slice %9 {offsets = [0, 127], sizes = [32, 1], strides = [1, 1]} : vector<32x128xf32> to vector<32x1xf32>
    %23 = vector.extract_strided_slice %9 {offsets = [0, 0], sizes = [32, 127], strides = [1, 1]} : vector<32x128xf32> to vector<32x127xf32>
    %24 = tpu.concatenate %22, %23 in 1 : vector<32x1xf32>, vector<32x127xf32> -> vector<32x128xf32>
    %25 = vector.extract_strided_slice %0 {offsets = [2, 0], sizes = [1, 128], strides = [1, 1]} : vector<7x128xf32> to vector<1x128xf32>
    %26 = vector.broadcast %25 : vector<1x128xf32> to vector<32x128xf32>
    %27 = arith.mulf %24, %26 : vector<32x128xf32>
    %28 = vector.extract_strided_slice %9 {offsets = [0, 1], sizes = [32, 127], strides = [1, 1]} : vector<32x128xf32> to vector<32x127xf32>
    %29 = vector.extract_strided_slice %9 {offsets = [0, 0], sizes = [32, 1], strides = [1, 1]} : vector<32x128xf32> to vector<32x1xf32>
    %30 = tpu.concatenate %28, %29 in 1 : vector<32x127xf32>, vector<32x1xf32> -> vector<32x128xf32>
    %31 = vector.extract_strided_slice %0 {offsets = [4, 0], sizes = [1, 128], strides = [1, 1]} : vector<7x128xf32> to vector<1x128xf32>
    %32 = vector.broadcast %31 : vector<1x128xf32> to vector<32x128xf32>
    %33 = arith.mulf %30, %32 : vector<32x128xf32>
    %34 = vector.extract_strided_slice %9 {offsets = [0, 2], sizes = [32, 126], strides = [1, 1]} : vector<32x128xf32> to vector<32x126xf32>
    %35 = vector.extract_strided_slice %9 {offsets = [0, 0], sizes = [32, 2], strides = [1, 1]} : vector<32x128xf32> to vector<32x2xf32>
    %36 = tpu.concatenate %34, %35 in 1 : vector<32x126xf32>, vector<32x2xf32> -> vector<32x128xf32>
    %37 = vector.extract_strided_slice %0 {offsets = [5, 0], sizes = [1, 128], strides = [1, 1]} : vector<7x128xf32> to vector<1x128xf32>
    %38 = vector.broadcast %37 : vector<1x128xf32> to vector<32x128xf32>
    %39 = arith.mulf %36, %38 : vector<32x128xf32>
    %40 = vector.extract_strided_slice %9 {offsets = [0, 3], sizes = [32, 125], strides = [1, 1]} : vector<32x128xf32> to vector<32x125xf32>
    %41 = vector.extract_strided_slice %9 {offsets = [0, 0], sizes = [32, 3], strides = [1, 1]} : vector<32x128xf32> to vector<32x3xf32>
    %42 = tpu.concatenate %40, %41 in 1 : vector<32x125xf32>, vector<32x3xf32> -> vector<32x128xf32>
    %43 = vector.extract_strided_slice %0 {offsets = [6, 0], sizes = [1, 128], strides = [1, 1]} : vector<7x128xf32> to vector<1x128xf32>
    %44 = vector.broadcast %43 : vector<1x128xf32> to vector<32x128xf32>
    %45 = arith.mulf %42, %44 : vector<32x128xf32>
    %46 = tpu.concatenate %15, %21, %27, %9, %33, %39, %45 in 0 : vector<32x128xf32>, vector<32x128xf32>, vector<32x128xf32>, vector<32x128xf32>, vector<32x128xf32>, vector<32x128xf32>, vector<32x128xf32> -> vector<224x128xf32>
    %cst_17 = arith.constant dense<0.000000e+00> : vector<64x128xf32>
    %47 = tpu.matmul %2, %46, %cst_17 {dimension_numbers = #tpu.dot_dimension_numbers<[1], [0], [0], [1], [0, 0, 1, 1], [], []>} : vector<64x224xf32>, vector<224x128xf32>, vector<64x128xf32> -> vector<64x128xf32>
    %48 = vector.broadcast %3 : vector<64x1xf32> to vector<64x128xf32>
    %49 = arith.addf %47, %48 : vector<64x128xf32>
    %50 = vector.extract_strided_slice %49 {offsets = [0, 0], sizes = [32, 128], strides = [1, 1]} : vector<64x128xf32> to vector<32x128xf32>
    %51 = math.tanh %50 : vector<32x128xf32>
    %52 = vector.extract_strided_slice %49 {offsets = [32, 0], sizes = [32, 128], strides = [1, 1]} : vector<64x128xf32> to vector<32x128xf32>
    %53 = arith.negf %52 : vector<32x128xf32>
    %54 = math.exp %53 : vector<32x128xf32>
    %cst_18 = arith.constant 1.000000e+00 : f32
    %55 = vector.broadcast %cst_18 : f32 to vector<32x128xf32>
    %56 = arith.addf %55, %54 : vector<32x128xf32>
    %57 = arith.divf %55, %56 : vector<32x128xf32>
    %58 = arith.mulf %51, %57 : vector<32x128xf32>
    %cst_19 = arith.constant 0.000000e+00 : f32
    %59 = vector.broadcast %cst_19 : f32 to vector<32x128xf32>
    %cst_20 = arith.constant 0.000000e+00 : f32
    %60 = vector.broadcast %cst_20 : f32 to vector<32x128xf32>
    %61 = vector.extract_strided_slice %58 {offsets = [0, 112], sizes = [32, 16], strides = [1, 1]} : vector<32x128xf32> to vector<32x16xf32>
    %62 = vector.extract_strided_slice %58 {offsets = [0, 0], sizes = [32, 112], strides = [1, 1]} : vector<32x128xf32> to vector<32x112xf32>
    %63 = tpu.concatenate %61, %62 in 1 : vector<32x16xf32>, vector<32x112xf32> -> vector<32x128xf32>
    %64 = vector.extract_strided_slice %1 {offsets = [0, 0, 0, 0], sizes = [1, 1, 2, 128], strides = [1, 1, 1, 1]} : vector<1x15x2x128xf32> to vector<1x1x2x128xf32>
    %65 = vector.shape_cast %64 : vector<1x1x2x128xf32> to vector<2x128xf32>
    %66 = vector.extract_strided_slice %65 {offsets = [0, 0], sizes = [1, 128], strides = [1, 1]} : vector<2x128xf32> to vector<1x128xf32>
    %67 = vector.broadcast %66 : vector<1x128xf32> to vector<32x128xf32>
    %68 = arith.mulf %63, %67 : vector<32x128xf32>
    %69 = arith.addf %59, %68 : vector<32x128xf32>
    %70 = vector.extract_strided_slice %65 {offsets = [1, 0], sizes = [1, 128], strides = [1, 1]} : vector<2x128xf32> to vector<1x128xf32>
    %71 = vector.broadcast %70 : vector<1x128xf32> to vector<32x128xf32>
    %72 = arith.mulf %63, %71 : vector<32x128xf32>
    %73 = arith.addf %60, %72 : vector<32x128xf32>
    %74 = vector.extract_strided_slice %58 {offsets = [0, 96], sizes = [32, 32], strides = [1, 1]} : vector<32x128xf32> to vector<32x32xf32>
    %75 = vector.extract_strided_slice %58 {offsets = [0, 0], sizes = [32, 96], strides = [1, 1]} : vector<32x128xf32> to vector<32x96xf32>
    %76 = tpu.concatenate %74, %75 in 1 : vector<32x32xf32>, vector<32x96xf32> -> vector<32x128xf32>
    %77 = vector.extract_strided_slice %1 {offsets = [0, 1, 0, 0], sizes = [1, 1, 2, 128], strides = [1, 1, 1, 1]} : vector<1x15x2x128xf32> to vector<1x1x2x128xf32>
    %78 = vector.shape_cast %77 : vector<1x1x2x128xf32> to vector<2x128xf32>
    %79 = vector.extract_strided_slice %78 {offsets = [0, 0], sizes = [1, 128], strides = [1, 1]} : vector<2x128xf32> to vector<1x128xf32>
    %80 = vector.broadcast %79 : vector<1x128xf32> to vector<32x128xf32>
    %81 = arith.mulf %76, %80 : vector<32x128xf32>
    %82 = arith.addf %69, %81 : vector<32x128xf32>
    %83 = vector.extract_strided_slice %78 {offsets = [1, 0], sizes = [1, 128], strides = [1, 1]} : vector<2x128xf32> to vector<1x128xf32>
    %84 = vector.broadcast %83 : vector<1x128xf32> to vector<32x128xf32>
    %85 = arith.mulf %76, %84 : vector<32x128xf32>
    %86 = arith.addf %73, %85 : vector<32x128xf32>
    %87 = vector.extract_strided_slice %58 {offsets = [0, 80], sizes = [32, 48], strides = [1, 1]} : vector<32x128xf32> to vector<32x48xf32>
    %88 = vector.extract_strided_slice %58 {offsets = [0, 0], sizes = [32, 80], strides = [1, 1]} : vector<32x128xf32> to vector<32x80xf32>
    %89 = tpu.concatenate %87, %88 in 1 : vector<32x48xf32>, vector<32x80xf32> -> vector<32x128xf32>
    %90 = vector.extract_strided_slice %1 {offsets = [0, 2, 0, 0], sizes = [1, 1, 2, 128], strides = [1, 1, 1, 1]} : vector<1x15x2x128xf32> to vector<1x1x2x128xf32>
    %91 = vector.shape_cast %90 : vector<1x1x2x128xf32> to vector<2x128xf32>
    %92 = vector.extract_strided_slice %91 {offsets = [0, 0], sizes = [1, 128], strides = [1, 1]} : vector<2x128xf32> to vector<1x128xf32>
    %93 = vector.broadcast %92 : vector<1x128xf32> to vector<32x128xf32>
    %94 = arith.mulf %89, %93 : vector<32x128xf32>
    %95 = arith.addf %82, %94 : vector<32x128xf32>
    %96 = vector.extract_strided_slice %91 {offsets = [1, 0], sizes = [1, 128], strides = [1, 1]} : vector<2x128xf32> to vector<1x128xf32>
    %97 = vector.broadcast %96 : vector<1x128xf32> to vector<32x128xf32>
    %98 = arith.mulf %89, %97 : vector<32x128xf32>
    %99 = arith.addf %86, %98 : vector<32x128xf32>
    %100 = vector.extract_strided_slice %58 {offsets = [0, 64], sizes = [32, 64], strides = [1, 1]} : vector<32x128xf32> to vector<32x64xf32>
    %101 = vector.extract_strided_slice %58 {offsets = [0, 0], sizes = [32, 64], strides = [1, 1]} : vector<32x128xf32> to vector<32x64xf32>
    %102 = tpu.concatenate %100, %101 in 1 : vector<32x64xf32>, vector<32x64xf32> -> vector<32x128xf32>
    %103 = vector.extract_strided_slice %1 {offsets = [0, 3, 0, 0], sizes = [1, 1, 2, 128], strides = [1, 1, 1, 1]} : vector<1x15x2x128xf32> to vector<1x1x2x128xf32>
    %104 = vector.shape_cast %103 : vector<1x1x2x128xf32> to vector<2x128xf32>
    %105 = vector.extract_strided_slice %104 {offsets = [0, 0], sizes = [1, 128], strides = [1, 1]} : vector<2x128xf32> to vector<1x128xf32>
    %106 = vector.broadcast %105 : vector<1x128xf32> to vector<32x128xf32>
    %107 = arith.mulf %102, %106 : vector<32x128xf32>
    %108 = arith.addf %95, %107 : vector<32x128xf32>
    %109 = vector.extract_strided_slice %104 {offsets = [1, 0], sizes = [1, 128], strides = [1, 1]} : vector<2x128xf32> to vector<1x128xf32>
    %110 = vector.broadcast %109 : vector<1x128xf32> to vector<32x128xf32>
    %111 = arith.mulf %102, %110 : vector<32x128xf32>
    %112 = arith.addf %99, %111 : vector<32x128xf32>
    %113 = vector.extract_strided_slice %58 {offsets = [0, 48], sizes = [32, 80], strides = [1, 1]} : vector<32x128xf32> to vector<32x80xf32>
    %114 = vector.extract_strided_slice %58 {offsets = [0, 0], sizes = [32, 48], strides = [1, 1]} : vector<32x128xf32> to vector<32x48xf32>
    %115 = tpu.concatenate %113, %114 in 1 : vector<32x80xf32>, vector<32x48xf32> -> vector<32x128xf32>
    %116 = vector.extract_strided_slice %1 {offsets = [0, 4, 0, 0], sizes = [1, 1, 2, 128], strides = [1, 1, 1, 1]} : vector<1x15x2x128xf32> to vector<1x1x2x128xf32>
    %117 = vector.shape_cast %116 : vector<1x1x2x128xf32> to vector<2x128xf32>
    %118 = vector.extract_strided_slice %117 {offsets = [0, 0], sizes = [1, 128], strides = [1, 1]} : vector<2x128xf32> to vector<1x128xf32>
    %119 = vector.broadcast %118 : vector<1x128xf32> to vector<32x128xf32>
    %120 = arith.mulf %115, %119 : vector<32x128xf32>
    %121 = arith.addf %108, %120 : vector<32x128xf32>
    %122 = vector.extract_strided_slice %117 {offsets = [1, 0], sizes = [1, 128], strides = [1, 1]} : vector<2x128xf32> to vector<1x128xf32>
    %123 = vector.broadcast %122 : vector<1x128xf32> to vector<32x128xf32>
    %124 = arith.mulf %115, %123 : vector<32x128xf32>
    %125 = arith.addf %112, %124 : vector<32x128xf32>
    %126 = vector.extract_strided_slice %58 {offsets = [0, 32], sizes = [32, 96], strides = [1, 1]} : vector<32x128xf32> to vector<32x96xf32>
    %127 = vector.extract_strided_slice %58 {offsets = [0, 0], sizes = [32, 32], strides = [1, 1]} : vector<32x128xf32> to vector<32x32xf32>
    %128 = tpu.concatenate %126, %127 in 1 : vector<32x96xf32>, vector<32x32xf32> -> vector<32x128xf32>
    %129 = vector.extract_strided_slice %1 {offsets = [0, 5, 0, 0], sizes = [1, 1, 2, 128], strides = [1, 1, 1, 1]} : vector<1x15x2x128xf32> to vector<1x1x2x128xf32>
    %130 = vector.shape_cast %129 : vector<1x1x2x128xf32> to vector<2x128xf32>
    %131 = vector.extract_strided_slice %130 {offsets = [0, 0], sizes = [1, 128], strides = [1, 1]} : vector<2x128xf32> to vector<1x128xf32>
    %132 = vector.broadcast %131 : vector<1x128xf32> to vector<32x128xf32>
    %133 = arith.mulf %128, %132 : vector<32x128xf32>
    %134 = arith.addf %121, %133 : vector<32x128xf32>
    %135 = vector.extract_strided_slice %130 {offsets = [1, 0], sizes = [1, 128], strides = [1, 1]} : vector<2x128xf32> to vector<1x128xf32>
    %136 = vector.broadcast %135 : vector<1x128xf32> to vector<32x128xf32>
    %137 = arith.mulf %128, %136 : vector<32x128xf32>
    %138 = arith.addf %125, %137 : vector<32x128xf32>
    %139 = vector.extract_strided_slice %58 {offsets = [0, 16], sizes = [32, 112], strides = [1, 1]} : vector<32x128xf32> to vector<32x112xf32>
    %140 = vector.extract_strided_slice %58 {offsets = [0, 0], sizes = [32, 16], strides = [1, 1]} : vector<32x128xf32> to vector<32x16xf32>
    %141 = tpu.concatenate %139, %140 in 1 : vector<32x112xf32>, vector<32x16xf32> -> vector<32x128xf32>
    %142 = vector.extract_strided_slice %1 {offsets = [0, 6, 0, 0], sizes = [1, 1, 2, 128], strides = [1, 1, 1, 1]} : vector<1x15x2x128xf32> to vector<1x1x2x128xf32>
    %143 = vector.shape_cast %142 : vector<1x1x2x128xf32> to vector<2x128xf32>
    %144 = vector.extract_strided_slice %143 {offsets = [0, 0], sizes = [1, 128], strides = [1, 1]} : vector<2x128xf32> to vector<1x128xf32>
    %145 = vector.broadcast %144 : vector<1x128xf32> to vector<32x128xf32>
    %146 = arith.mulf %141, %145 : vector<32x128xf32>
    %147 = arith.addf %134, %146 : vector<32x128xf32>
    %148 = vector.extract_strided_slice %143 {offsets = [1, 0], sizes = [1, 128], strides = [1, 1]} : vector<2x128xf32> to vector<1x128xf32>
    %149 = vector.broadcast %148 : vector<1x128xf32> to vector<32x128xf32>
    %150 = arith.mulf %141, %149 : vector<32x128xf32>
    %151 = arith.addf %138, %150 : vector<32x128xf32>
    %152 = vector.extract_strided_slice %1 {offsets = [0, 7, 0, 0], sizes = [1, 1, 2, 128], strides = [1, 1, 1, 1]} : vector<1x15x2x128xf32> to vector<1x1x2x128xf32>
    %153 = vector.shape_cast %152 : vector<1x1x2x128xf32> to vector<2x128xf32>
    %154 = vector.extract_strided_slice %153 {offsets = [0, 0], sizes = [1, 128], strides = [1, 1]} : vector<2x128xf32> to vector<1x128xf32>
    %155 = vector.broadcast %154 : vector<1x128xf32> to vector<32x128xf32>
    %156 = arith.mulf %58, %155 : vector<32x128xf32>
    %157 = arith.addf %147, %156 : vector<32x128xf32>
    %158 = vector.extract_strided_slice %153 {offsets = [1, 0], sizes = [1, 128], strides = [1, 1]} : vector<2x128xf32> to vector<1x128xf32>
    %159 = vector.broadcast %158 : vector<1x128xf32> to vector<32x128xf32>
    %160 = arith.mulf %58, %159 : vector<32x128xf32>
    %161 = arith.addf %151, %160 : vector<32x128xf32>
    %162 = vector.extract_strided_slice %58 {offsets = [0, 112], sizes = [32, 16], strides = [1, 1]} : vector<32x128xf32> to vector<32x16xf32>
    %163 = vector.extract_strided_slice %58 {offsets = [0, 0], sizes = [32, 112], strides = [1, 1]} : vector<32x128xf32> to vector<32x112xf32>
    %164 = tpu.concatenate %162, %163 in 1 : vector<32x16xf32>, vector<32x112xf32> -> vector<32x128xf32>
    %165 = vector.extract_strided_slice %1 {offsets = [0, 8, 0, 0], sizes = [1, 1, 2, 128], strides = [1, 1, 1, 1]} : vector<1x15x2x128xf32> to vector<1x1x2x128xf32>
    %166 = vector.shape_cast %165 : vector<1x1x2x128xf32> to vector<2x128xf32>
    %167 = vector.extract_strided_slice %166 {offsets = [0, 0], sizes = [1, 128], strides = [1, 1]} : vector<2x128xf32> to vector<1x128xf32>
    %168 = vector.broadcast %167 : vector<1x128xf32> to vector<32x128xf32>
    %169 = arith.mulf %164, %168 : vector<32x128xf32>
    %170 = arith.addf %157, %169 : vector<32x128xf32>
    %171 = vector.extract_strided_slice %166 {offsets = [1, 0], sizes = [1, 128], strides = [1, 1]} : vector<2x128xf32> to vector<1x128xf32>
    %172 = vector.broadcast %171 : vector<1x128xf32> to vector<32x128xf32>
    %173 = arith.mulf %164, %172 : vector<32x128xf32>
    %174 = arith.addf %161, %173 : vector<32x128xf32>
    %175 = vector.extract_strided_slice %58 {offsets = [0, 96], sizes = [32, 32], strides = [1, 1]} : vector<32x128xf32> to vector<32x32xf32>
    %176 = vector.extract_strided_slice %58 {offsets = [0, 0], sizes = [32, 96], strides = [1, 1]} : vector<32x128xf32> to vector<32x96xf32>
    %177 = tpu.concatenate %175, %176 in 1 : vector<32x32xf32>, vector<32x96xf32> -> vector<32x128xf32>
    %178 = vector.extract_strided_slice %1 {offsets = [0, 9, 0, 0], sizes = [1, 1, 2, 128], strides = [1, 1, 1, 1]} : vector<1x15x2x128xf32> to vector<1x1x2x128xf32>
    %179 = vector.shape_cast %178 : vector<1x1x2x128xf32> to vector<2x128xf32>
    %180 = vector.extract_strided_slice %179 {offsets = [0, 0], sizes = [1, 128], strides = [1, 1]} : vector<2x128xf32> to vector<1x128xf32>
    %181 = vector.broadcast %180 : vector<1x128xf32> to vector<32x128xf32>
    %182 = arith.mulf %177, %181 : vector<32x128xf32>
    %183 = arith.addf %170, %182 : vector<32x128xf32>
    %184 = vector.extract_strided_slice %179 {offsets = [1, 0], sizes = [1, 128], strides = [1, 1]} : vector<2x128xf32> to vector<1x128xf32>
    %185 = vector.broadcast %184 : vector<1x128xf32> to vector<32x128xf32>
    %186 = arith.mulf %177, %185 : vector<32x128xf32>
    %187 = arith.addf %174, %186 : vector<32x128xf32>
    %188 = vector.extract_strided_slice %58 {offsets = [0, 80], sizes = [32, 48], strides = [1, 1]} : vector<32x128xf32> to vector<32x48xf32>
    %189 = vector.extract_strided_slice %58 {offsets = [0, 0], sizes = [32, 80], strides = [1, 1]} : vector<32x128xf32> to vector<32x80xf32>
    %190 = tpu.concatenate %188, %189 in 1 : vector<32x48xf32>, vector<32x80xf32> -> vector<32x128xf32>
    %191 = vector.extract_strided_slice %1 {offsets = [0, 10, 0, 0], sizes = [1, 1, 2, 128], strides = [1, 1, 1, 1]} : vector<1x15x2x128xf32> to vector<1x1x2x128xf32>
    %192 = vector.shape_cast %191 : vector<1x1x2x128xf32> to vector<2x128xf32>
    %193 = vector.extract_strided_slice %192 {offsets = [0, 0], sizes = [1, 128], strides = [1, 1]} : vector<2x128xf32> to vector<1x128xf32>
    %194 = vector.broadcast %193 : vector<1x128xf32> to vector<32x128xf32>
    %195 = arith.mulf %190, %194 : vector<32x128xf32>
    %196 = arith.addf %183, %195 : vector<32x128xf32>
    %197 = vector.extract_strided_slice %192 {offsets = [1, 0], sizes = [1, 128], strides = [1, 1]} : vector<2x128xf32> to vector<1x128xf32>
    %198 = vector.broadcast %197 : vector<1x128xf32> to vector<32x128xf32>
    %199 = arith.mulf %190, %198 : vector<32x128xf32>
    %200 = arith.addf %187, %199 : vector<32x128xf32>
    %201 = vector.extract_strided_slice %58 {offsets = [0, 64], sizes = [32, 64], strides = [1, 1]} : vector<32x128xf32> to vector<32x64xf32>
    %202 = vector.extract_strided_slice %58 {offsets = [0, 0], sizes = [32, 64], strides = [1, 1]} : vector<32x128xf32> to vector<32x64xf32>
    %203 = tpu.concatenate %201, %202 in 1 : vector<32x64xf32>, vector<32x64xf32> -> vector<32x128xf32>
    %204 = vector.extract_strided_slice %1 {offsets = [0, 11, 0, 0], sizes = [1, 1, 2, 128], strides = [1, 1, 1, 1]} : vector<1x15x2x128xf32> to vector<1x1x2x128xf32>
    %205 = vector.shape_cast %204 : vector<1x1x2x128xf32> to vector<2x128xf32>
    %206 = vector.extract_strided_slice %205 {offsets = [0, 0], sizes = [1, 128], strides = [1, 1]} : vector<2x128xf32> to vector<1x128xf32>
    %207 = vector.broadcast %206 : vector<1x128xf32> to vector<32x128xf32>
    %208 = arith.mulf %203, %207 : vector<32x128xf32>
    %209 = arith.addf %196, %208 : vector<32x128xf32>
    %210 = vector.extract_strided_slice %205 {offsets = [1, 0], sizes = [1, 128], strides = [1, 1]} : vector<2x128xf32> to vector<1x128xf32>
    %211 = vector.broadcast %210 : vector<1x128xf32> to vector<32x128xf32>
    %212 = arith.mulf %203, %211 : vector<32x128xf32>
    %213 = arith.addf %200, %212 : vector<32x128xf32>
    %214 = vector.extract_strided_slice %58 {offsets = [0, 48], sizes = [32, 80], strides = [1, 1]} : vector<32x128xf32> to vector<32x80xf32>
    %215 = vector.extract_strided_slice %58 {offsets = [0, 0], sizes = [32, 48], strides = [1, 1]} : vector<32x128xf32> to vector<32x48xf32>
    %216 = tpu.concatenate %214, %215 in 1 : vector<32x80xf32>, vector<32x48xf32> -> vector<32x128xf32>
    %217 = vector.extract_strided_slice %1 {offsets = [0, 12, 0, 0], sizes = [1, 1, 2, 128], strides = [1, 1, 1, 1]} : vector<1x15x2x128xf32> to vector<1x1x2x128xf32>
    %218 = vector.shape_cast %217 : vector<1x1x2x128xf32> to vector<2x128xf32>
    %219 = vector.extract_strided_slice %218 {offsets = [0, 0], sizes = [1, 128], strides = [1, 1]} : vector<2x128xf32> to vector<1x128xf32>
    %220 = vector.broadcast %219 : vector<1x128xf32> to vector<32x128xf32>
    %221 = arith.mulf %216, %220 : vector<32x128xf32>
    %222 = arith.addf %209, %221 : vector<32x128xf32>
    %223 = vector.extract_strided_slice %218 {offsets = [1, 0], sizes = [1, 128], strides = [1, 1]} : vector<2x128xf32> to vector<1x128xf32>
    %224 = vector.broadcast %223 : vector<1x128xf32> to vector<32x128xf32>
    %225 = arith.mulf %216, %224 : vector<32x128xf32>
    %226 = arith.addf %213, %225 : vector<32x128xf32>
    %227 = vector.extract_strided_slice %58 {offsets = [0, 32], sizes = [32, 96], strides = [1, 1]} : vector<32x128xf32> to vector<32x96xf32>
    %228 = vector.extract_strided_slice %58 {offsets = [0, 0], sizes = [32, 32], strides = [1, 1]} : vector<32x128xf32> to vector<32x32xf32>
    %229 = tpu.concatenate %227, %228 in 1 : vector<32x96xf32>, vector<32x32xf32> -> vector<32x128xf32>
    %230 = vector.extract_strided_slice %1 {offsets = [0, 13, 0, 0], sizes = [1, 1, 2, 128], strides = [1, 1, 1, 1]} : vector<1x15x2x128xf32> to vector<1x1x2x128xf32>
    %231 = vector.shape_cast %230 : vector<1x1x2x128xf32> to vector<2x128xf32>
    %232 = vector.extract_strided_slice %231 {offsets = [0, 0], sizes = [1, 128], strides = [1, 1]} : vector<2x128xf32> to vector<1x128xf32>
    %233 = vector.broadcast %232 : vector<1x128xf32> to vector<32x128xf32>
    %234 = arith.mulf %229, %233 : vector<32x128xf32>
    %235 = arith.addf %222, %234 : vector<32x128xf32>
    %236 = vector.extract_strided_slice %231 {offsets = [1, 0], sizes = [1, 128], strides = [1, 1]} : vector<2x128xf32> to vector<1x128xf32>
    %237 = vector.broadcast %236 : vector<1x128xf32> to vector<32x128xf32>
    %238 = arith.mulf %229, %237 : vector<32x128xf32>
    %239 = arith.addf %226, %238 : vector<32x128xf32>
    %240 = vector.extract_strided_slice %58 {offsets = [0, 16], sizes = [32, 112], strides = [1, 1]} : vector<32x128xf32> to vector<32x112xf32>
    %241 = vector.extract_strided_slice %58 {offsets = [0, 0], sizes = [32, 16], strides = [1, 1]} : vector<32x128xf32> to vector<32x16xf32>
    %242 = tpu.concatenate %240, %241 in 1 : vector<32x112xf32>, vector<32x16xf32> -> vector<32x128xf32>
    %243 = vector.extract_strided_slice %1 {offsets = [0, 14, 0, 0], sizes = [1, 1, 2, 128], strides = [1, 1, 1, 1]} : vector<1x15x2x128xf32> to vector<1x1x2x128xf32>
    %244 = vector.shape_cast %243 : vector<1x1x2x128xf32> to vector<2x128xf32>
    %245 = vector.extract_strided_slice %244 {offsets = [0, 0], sizes = [1, 128], strides = [1, 1]} : vector<2x128xf32> to vector<1x128xf32>
    %246 = vector.broadcast %245 : vector<1x128xf32> to vector<32x128xf32>
    %247 = arith.mulf %242, %246 : vector<32x128xf32>
    %248 = arith.addf %235, %247 : vector<32x128xf32>
    %249 = vector.extract_strided_slice %244 {offsets = [1, 0], sizes = [1, 128], strides = [1, 1]} : vector<2x128xf32> to vector<1x128xf32>
    %250 = vector.broadcast %249 : vector<1x128xf32> to vector<32x128xf32>
    %251 = arith.mulf %242, %250 : vector<32x128xf32>
    %252 = arith.addf %239, %251 : vector<32x128xf32>
    %253 = tpu.concatenate %58, %248, %252 in 0 : vector<32x128xf32>, vector<32x128xf32>, vector<32x128xf32> -> vector<96x128xf32>
    %cst_21 = arith.constant dense<0.000000e+00> : vector<32x128xf32>
    %254 = tpu.matmul %4, %253, %cst_21 {dimension_numbers = #tpu.dot_dimension_numbers<[1], [0], [0], [1], [0, 0, 1, 1], [], []>} : vector<32x96xf32>, vector<96x128xf32>, vector<32x128xf32> -> vector<32x128xf32>
    %255 = vector.broadcast %5 : vector<32x1xf32> to vector<32x128xf32>
    %256 = arith.addf %254, %255 : vector<32x128xf32>
    %257 = arith.addf %256, %9 : vector<32x128xf32>
    %c0_22 = arith.constant 0 : index
    %c0_23 = arith.constant 0 : index
    %c0_24 = arith.constant 0 : index
    %258 = vector.load %arg8[%c0_22, %c0_23, %c0_24] : memref<1x32x128xf32, #tpu.memory_space<vmem>>, vector<1x32x128xf32>
    %259 = vector.shape_cast %258 : vector<1x32x128xf32> to vector<32x128xf32>
    %260 = vector.shape_cast %257 : vector<32x128xf32> to vector<1x32x128xf32>
    tpu.vector_store %arg8[%c0_22, %c0_23, %c0_24], %260 {strides = array<i32>} : memref<1x32x128xf32, #tpu.memory_space<vmem>>, vector<1x32x128xf32>,
    %cst_25 = arith.constant dense<0.000000e+00> : vector<32xf32>
    %261 = vector.multi_reduction <add>, %257, %cst_25 [1] : vector<32x128xf32> to vector<32xf32>
    %262 = vector.shape_cast %261 : vector<32xf32> to vector<32x1xf32>
    %263 = arith.addf %6, %262 : vector<32x1xf32>
    %264 = arith.mulf %257, %257 : vector<32x128xf32>
    %cst_26 = arith.constant dense<0.000000e+00> : vector<32xf32>
    %265 = vector.multi_reduction <add>, %264, %cst_26 [1] : vector<32x128xf32> to vector<32xf32>
    %266 = vector.shape_cast %265 : vector<32xf32> to vector<32x1xf32>
    %267 = arith.addf %7, %266 : vector<32x1xf32>
    %268 = tpu.concatenate %263, %267 in 0 : vector<32x1xf32>, vector<32x1xf32> -> vector<64x1xf32>
    %c0_27 = arith.constant 0 : index
    %c0_28 = arith.constant 0 : index
    %c0_29 = arith.constant 0 : index
    %269 = vector.load %arg9[%c0_27, %c0_28, %c0_29] : memref<1x64x1xf32, #tpu.memory_space<vmem>>, vector<1x64x1xf32>
    %270 = vector.shape_cast %269 : vector<1x64x1xf32> to vector<64x1xf32>
    %271 = vector.shape_cast %268 : vector<64x1xf32> to vector<1x64x1xf32>
    tpu.vector_store %arg9[%c0_27, %c0_28, %c0_29], %271 {strides = array<i32>} : memref<1x64x1xf32, #tpu.memory_space<vmem>>, vector<1x64x1xf32>,
    return
  }
  func.func @transform_0(%arg0: i32) -> (i32, i32, i32) {
    %c0_i32 = arith.constant 0 : i32
    %c0_i32_0 = arith.constant 0 : i32
    %c0_i32_1 = arith.constant 0 : i32
    return %arg0, %c0_i32, %c0_i32_0 : i32, i32, i32
  }
  func.func @transform_1(%arg0: i32) -> (i32, i32, i32, i32) {
    %c0_i32 = arith.constant 0 : i32
    %c0_i32_0 = arith.constant 0 : i32
    %c0_i32_1 = arith.constant 0 : i32
    %c0_i32_2 = arith.constant 0 : i32
    return %arg0, %c0_i32, %c0_i32_0, %c0_i32_1 : i32, i32, i32, i32
  }
  func.func @transform_2(%arg0: i32) -> (i32, i32) {
    %c0_i32 = arith.constant 0 : i32
    %c0_i32_0 = arith.constant 0 : i32
    %c0_i32_1 = arith.constant 0 : i32
    return %c0_i32, %c0_i32_0 : i32, i32
  }
  func.func @transform_3(%arg0: i32) -> (i32, i32) {
    %c0_i32 = arith.constant 0 : i32
    %c0_i32_0 = arith.constant 0 : i32
    %c0_i32_1 = arith.constant 0 : i32
    return %c0_i32, %c0_i32_0 : i32, i32
  }
  func.func @transform_4(%arg0: i32) -> (i32, i32) {
    %c0_i32 = arith.constant 0 : i32
    %c0_i32_0 = arith.constant 0 : i32
    %c0_i32_1 = arith.constant 0 : i32
    return %c0_i32, %c0_i32_0 : i32, i32
  }
  func.func @transform_5(%arg0: i32) -> (i32, i32) {
    %c0_i32 = arith.constant 0 : i32
    %c0_i32_0 = arith.constant 0 : i32
    %c0_i32_1 = arith.constant 0 : i32
    return %c0_i32, %c0_i32_0 : i32, i32
  }
  func.func @transform_6(%arg0: i32) -> (i32, i32) {
    %c0_i32 = arith.constant 0 : i32
    %c0_i32_0 = arith.constant 0 : i32
    %c0_i32_1 = arith.constant 0 : i32
    return %c0_i32, %c0_i32_0 : i32, i32
  }
  func.func @transform_7(%arg0: i32) -> (i32, i32, i32) {
    %c0_i32 = arith.constant 0 : i32
    %c0_i32_0 = arith.constant 0 : i32
    %c0_i32_1 = arith.constant 0 : i32
    return %arg0, %c0_i32, %c0_i32_0 : i32, i32, i32
  }
  func.func @transform_8(%arg0: i32) -> (i32, i32, i32) {
    %c0_i32 = arith.constant 0 : i32
    %c0_i32_0 = arith.constant 0 : i32
    %c0_i32_1 = arith.constant 0 : i32
    return %arg0, %c0_i32, %c0_i32_0 : i32, i32, i32
  }
}

module attributes {stable_mosaic.version = 11 : i64} {
  func.func @_bn_apply_kernel(%arg0: i32, %arg1: memref<1x32x128xf32, #tpu.memory_space<vmem>>, %arg2: memref<32x1xf32, #tpu.memory_space<vmem>>, %arg3: memref<32x1xf32, #tpu.memory_space<vmem>>, %arg4: memref<1x32x128xf32, #tpu.memory_space<vmem>>) attributes {dimension_semantics = [#tpu.dimension_semantics<parallel>], iteration_bounds = array<i64: 2>, scalar_prefetch = 0 : i64, scratch_operands = 0 : i64, tpu.core_type = #tpu.core_type<tc>, window_params = [{transform_indices = @transform_0, window_bounds = array<i64: 1, 32, 128>}, {pipeline_mode = #tpu.pipeline_mode<synchronous>, transform_indices = @transform_1, window_bounds = array<i64: 32, 1>}, {pipeline_mode = #tpu.pipeline_mode<synchronous>, transform_indices = @transform_2, window_bounds = array<i64: 32, 1>}, {transform_indices = @transform_3, window_bounds = array<i64: 1, 32, 128>}]} {
    %c0 = arith.constant 0 : index
    %c0_0 = arith.constant 0 : index
    %c0_1 = arith.constant 0 : index
    %0 = vector.load %arg1[%c0, %c0_0, %c0_1] : memref<1x32x128xf32, #tpu.memory_space<vmem>>, vector<1x32x128xf32>
    %c0_2 = arith.constant 0 : index
    %c0_3 = arith.constant 0 : index
    %1 = vector.load %arg2[%c0_2, %c0_3] : memref<32x1xf32, #tpu.memory_space<vmem>>, vector<32x1xf32>
    %2 = vector.shape_cast %1 : vector<32x1xf32> to vector<1x32x1xf32>
    %3 = vector.broadcast %2 : vector<1x32x1xf32> to vector<1x32x128xf32>
    %4 = arith.mulf %0, %3 : vector<1x32x128xf32>
    %c0_4 = arith.constant 0 : index
    %c0_5 = arith.constant 0 : index
    %5 = vector.load %arg3[%c0_4, %c0_5] : memref<32x1xf32, #tpu.memory_space<vmem>>, vector<32x1xf32>
    %6 = vector.shape_cast %5 : vector<32x1xf32> to vector<1x32x1xf32>
    %7 = vector.broadcast %6 : vector<1x32x1xf32> to vector<1x32x128xf32>
    %8 = arith.addf %4, %7 : vector<1x32x128xf32>
    %c0_6 = arith.constant 0 : index
    %c0_7 = arith.constant 0 : index
    %c0_8 = arith.constant 0 : index
    %9 = vector.load %arg4[%c0_6, %c0_7, %c0_8] : memref<1x32x128xf32, #tpu.memory_space<vmem>>, vector<1x32x128xf32>
    tpu.vector_store %arg4[%c0_6, %c0_7, %c0_8], %8 {strides = array<i32>} : memref<1x32x128xf32, #tpu.memory_space<vmem>>, vector<1x32x128xf32>,
    return
  }
  func.func @transform_0(%arg0: i32) -> (i32, i32, i32) {
    %c0_i32 = arith.constant 0 : i32
    %c0_i32_0 = arith.constant 0 : i32
    %c0_i32_1 = arith.constant 0 : i32
    return %arg0, %c0_i32, %c0_i32_0 : i32, i32, i32
  }
  func.func @transform_1(%arg0: i32) -> (i32, i32) {
    %c0_i32 = arith.constant 0 : i32
    %c0_i32_0 = arith.constant 0 : i32
    %c0_i32_1 = arith.constant 0 : i32
    return %c0_i32, %c0_i32_0 : i32, i32
  }
  func.func @transform_2(%arg0: i32) -> (i32, i32) {
    %c0_i32 = arith.constant 0 : i32
    %c0_i32_0 = arith.constant 0 : i32
    %c0_i32_1 = arith.constant 0 : i32
    return %c0_i32, %c0_i32_0 : i32, i32
  }
  func.func @transform_3(%arg0: i32) -> (i32, i32, i32) {
    %c0_i32 = arith.constant 0 : i32
    %c0_i32_0 = arith.constant 0 : i32
    %c0_i32_1 = arith.constant 0 : i32
    return %arg0, %c0_i32, %c0_i32_0 : i32, i32, i32
  }
}

</mosaic_0001>

<bundles_post_ra>
// kernel: de_stblock_forward.3
= control target key start
LH: loop header
LB: loop body
LE: loop exit
PB: predicated region body
PF: predicated region fallthrough
CT: control target
= control target key end

     0   :  { %s344_s12 = smov 0   ;;  %s385_s0 = inlined_call_operand.vmem [shape: f32[2,32,128], index: 0, kind: input, shape index: {}, may-alias: {0,3}]   ;;  %s386_s1 = inlined_call_operand.vmem [shape: f32[32,1], index: 1, kind: input, shape index: {}]   ;;  %s387_s2 = inlined_call_operand.vmem [shape: f32[32,1], index: 2, kind: input, shape index: {}]   ;;  %s388_s3 = inlined_call_operand.vmem [shape: f32[2,32,128], index: 3, kind: output, shape index: {}, may-alias: {0,3}]  }
   0x1 LB: > { %s290_s13 = sadd.s32 4294967295, %s321_s12   ;;  %p294_p0 = scmp.ge.s32.totalorder %s321_s12, 1  ;;  %s321_s12 = sphi %s344_s12, %s13_s12  }
   0x2   : > { %p137_p1 = scmp.lt.s32.totalorder %s321_s12, 3 }
   0x4   : > { %p138_p2 = pnand %p294_p0, %p137_p1 }
   0x5   : > { %p161_p3 = scmp.lt.s32.totalorder (!%p138_p2), %s290_s13, 1 }
   0x6   : > { %141 = sbr.rel (%p138_p2) target bundleno = 148 (0x94), region = 32 }
   0xb   : > { %v177_v0 = vld [vmem:[%s386_s1 + $0x10] sm:$0xff]  ;;  %v175_v1 = vld [vmem:[%s386_s1] sm:$0xff]  ;;  %v323_v2 = vmov 0   ;;  %v178_v4 = vld [vmem:[%s386_s1 + $0x18] sm:$0xff]  ;;  %s390_s13 = smov (!%p161_p3, %s290_s13), 1 }
   0xc   : > { %313 = vset.pattern.permute.xlu1 %v323_v2  ;;  %312 = vset.pattern.permute.xlu0 %v323_v2  ;;  %v203_v3 = vld [vmem:[%s387_s2] sm:$0xff]  ;;  %v176_v5 = vld [vmem:[%s386_s1 + $0x8] sm:$0xff]  ;;  %v206_v7 = vld [vmem:[%s387_s2 + $0x18] sm:$0xff]  ;;  %s301_s30 = sshll.u32 %s390_s13, 5 }
   0xd   : > { %191 = vperm.xlu1 %313, %v177_v0   ;;  %181 = vperm.xlu0 %312, %v175_v1   ;;  %v204_v6 = vld [vmem:[%s387_s2 + $0x8] sm:$0xff]  ;;  %v205_v8 = vld [vmem:[%s387_s2 + $0x10] sm:$0xff]  ;;  %s165_s6 = scalar_lea.vmem %s385_s0, %s301_s30  ;;  %s170_s9 = scalar_lea.vmem %s388_s3, %s301_s30 }
   0xe   : > { %314 = vset.pattern.permute.xlu2 %v323_v2  ;;  %v171_v9 = vld [vmem:[%s165_s6] sm:$0xff]  ;;  %v174_v14 = vld [vmem:[%s165_s6 + $0x18] sm:$0xff]  ;;  %v172_v15 = vld [vmem:[%s165_s6 + $0x8] sm:$0xff] }
   0xf   : > { %209 = vperm.xlu2 %314, %v203_v3   ;;  %v173_v17 = vld [vmem:[%s165_s6 + $0x10] sm:$0xff] }
  0x15   : > { %196 = vperm.xlu1 %313, %v178_v4   ;;  %186 = vperm.xlu0 %312, %v176_v5  }
  0x17   : > { %214 = vperm.xlu2 %314, %v204_v6  }
  0x1d   : > { %224 = vperm.xlu1 %313, %v206_v7   ;;  %219 = vperm.xlu0 %312, %v205_v8  }
  0x69   : > { %v210_v10 = vpop.permute.xlu2 %209 }
  0x71   : > { %v215_v21 = vpop.permute.xlu2 %214 }
  0x7f   : > { %v192_v11 = vpop.permute.xlu1 %191  ;;  %v182_v12 = vpop.permute.xlu0 %181 }
  0x80   : > { %v199_v13 = vmul.f32 %v182_v12, %v171_v9  ;;  %v201_v23 = vmul.f32 %v192_v11, %v173_v17 }
  0x82   : > { %v227_v16 = vadd.f32 %v210_v10, %v199_v13 }
  0x84   : > { %231 = vst [vmem:[%s170_s9] sm:$0xff] %v227_v16 }
  0x87   : > { %v197_v18 = vpop.permute.xlu1 %196  ;;  %v187_v19 = vpop.permute.xlu0 %186 }
  0x88   : > { %v200_v20 = vmul.f32 %v187_v19, %v172_v15  ;;  %v202_v24 = vmul.f32 %v197_v18, %v174_v14 }
  0x8a   : > { %v228_v22 = vadd.f32 %v215_v21, %v200_v20 }
  0x8c   : > { %232 = vst [vmem:[%s170_s9 + $0x8] sm:$0xff] %v228_v22 }
  0x8f   : > { %v225_v25 = vpop.permute.xlu1 %224  ;;  %v220_v26 = vpop.permute.xlu0 %219 }
  0x90   : > { %v230_v27 = vadd.f32 %v225_v25, %v202_v24  ;;  %v229_v28 = vadd.f32 %v220_v26, %v201_v23 }
  0x92   : > { %234 = vst [vmem:[%s170_s9 + $0x18] sm:$0xff] %v230_v27 }
  0x93   : > { %233 = vst [vmem:[%s170_s9 + $0x10] sm:$0xff] %v229_v28 }
  0x94 PF: > { %s13_s12 = sadd.s32 1, %s321_s12  }
  0x95   : > { %p10_p4 = scmp.ge.s32.totalorder %s13_s12, 4  }
  0x97   :  { %12 = sbr.rel (!%p10_p4) target bundleno = 1 (0x1), region = 62 }

// kernel: de_stblock_forward.2
= control target key start
LH: loop header
LB: loop body
LE: loop exit
PB: predicated region body
PF: predicated region fallthrough
CT: control target
= control target key end

     0   :  { %s1462_s27 = smov 0   ;;  %s2148_s0 = inlined_call_operand.vmem [shape: f32[2,32,128], index: 0, kind: input, shape index: {}]   ;;  %s2149_s1 = inlined_call_operand.vmem [shape: f32[2,15,2,128], index: 1, kind: input, shape index: {}]   ;;  %s2150_s2 = inlined_call_operand.vmem [shape: f32[7,128], index: 2, kind: input, shape index: {}]   ;;  %s2151_s3 = inlined_call_operand.vmem [shape: f32[64,224], index: 3, kind: input, shape index: {}]   ;;  %s2152_s4 = inlined_call_operand.vmem [shape: f32[64,1], index: 4, kind: input, shape index: {}]   ;;  %s2153_s5 = inlined_call_operand.vmem [shape: f32[32,96], index: 5, kind: input, shape index: {}]   ;;  %s2154_s6 = inlined_call_operand.vmem [shape: f32[32,1], index: 6, kind: input, shape index: {}]   ;;  %s2155_s7 = inlined_call_operand.vmem [shape: f32[2,32,128], index: 7, kind: output, shape index: {0}]   ;;  %s2156_s8 = inlined_call_operand.vmem [shape: f32[2,64,1], index: 8, kind: output, shape index: {1}]  }
   0x1 LB: > { %s1292_s28 = sadd.s32 4294967295, %s1401_s27   ;;  %p1296_p0 = scmp.ge.s32.totalorder %s1401_s27, 1  ;;  %s1401_s27 = sphi %s1462_s27, %s19_s27  }
   0x2   : > { %p275_p1 = scmp.lt.s32.totalorder %s1401_s27, 3 }
   0x4   : > { %p276_p2 = pnand %p1296_p0, %p275_p1 }
   0x6   : > { %279 = sbr.rel (%p276_p2) target bundleno = 897 (0x381), region = 48 }
   0xb   : > { %p319_p3 = scmp.lt.s32.totalorder %s1292_s28, 1  ;;  %s1403_s11 = smov 125   ;;  %v1487_v5 = vld [vmem:[%s2150_s2] sm:$0x7f]  ;;  %v356_v34 = vld [vmem:[%s2151_s3 + $0x8] sm:$0xff]  ;;  %vm538_vm0 = vcmask 785408  }
   0xc   : > { %s1404_s12 = smov 126   ;;  %s1405_s13 = smov 127   ;;  %v493_v7 = vperm.slane %v1487_v5, 6  ;;  %v476_v16 = vperm.slane %v1487_v5, 5  ;;  %v459_v24 = vperm.slane %v1487_v5, 4  ;;  %v442_v33 = vperm.slane %v1487_v5, 2 }
   0xd   : > { %s2230_s28 = smov (!%p319_p3, %s1292_s28), 1  ;;  %s1406_s14 = smov 1   ;;  %v377_v39 = vld [vmem:[%s2152_s4 + $0x30] sm:$0xff]  ;;  %v1409_v40 = vmov 0   ;;  %v358_v43 = vld [vmem:[%s2151_s3 + $0x18] sm:$0xff]  ;;  %v424_v44 = vperm.slane %v1487_v5, 1 }
   0xe   : > { %s1322_s29 = sshll.u32 %s2230_s28, 5  ;;  %s1407_s15 = smov 2   ;;  %1365 = vset.pattern.permute.xlu1 %v1409_v40  ;;  %1366 = vset.pattern.permute.xlu2 %v1409_v40  ;;  %v375_v49 = vld [vmem:[%s2152_s4 + $0x20] sm:$0xff]  ;;  %v360_v51 = vld [vmem:[%s2151_s3 + $0x28] sm:$0xff]  ;;  %v407_v53 = vperm.slane %v1487_v5, 0  ;;  %v378_v58 = vld [vmem:[%s2152_s4 + $0x38] sm:$0xff] }
   0xf   : > { %s1478_s10 = scalar_lea.vmem %s2148_s0, %s1322_s29  ;;  %s1408_s16 = smov 3   ;;  %1364 = vset.pattern.permute.xlu0 %v1409_v40  ;;  %v376_v59 = vld [vmem:[%s2152_s4 + $0x28] sm:$0xff]  ;;  %v362_v62 = vld [vmem:[%s2151_s3 + $0x38] sm:$0xff] }
  0x10   : > { %v390_v0 = vld [vmem:[%s1478_s10 + $0x18] sm:$0xff]  ;;  %v388_v1 = vld [vmem:[%s1478_s10 + $0x8] sm:$0xff]  ;;  %v389_v2 = vld [vmem:[%s1478_s10 + $0x10] sm:$0xff]  ;;  %s1414_s17 = smov 64   ;;  %s1415_s18 = smov 96  }
  0x11   : > { %487 = vrot.lane.b32.xlu0 %v390_v0, %s1403_s11  ;;  %483 = vrot.lane.b32.xlu1 %v388_v1, %s1403_s11  ;;  %v387_v3 = vld [vmem:[%s1478_s10] sm:$0xff]  ;;  %v372_v60 = vld [vmem:[%s2152_s4 + $0x8] sm:$0xff]  ;;  %s1416_s19 = smov 112   ;;  %s1341_s9 = smul.u32 30, %s2230_s28 }
  0x12   : > { %470 = vrot.lane.b32.xlu2 %v390_v0, %s1404_s12  ;;  %563 = vmatpush.msra.mxu0 %v390_v0  ;;  %v374_v5 = vld [vmem:[%s2152_s4 + $0x18] sm:$0xff]  ;;  %s333_s24 = scalar_lea.vmem %s2155_s7, %s1322_s29  ;;  %s1324_s29 = sshll.u32 %s2230_s28, 6 }
  0x13   : > { %1325 = vmatpush.msra.mxu3 %v390_v0  ;;  %s338_s30 = scalar_lea.vmem %s2156_s8, %s1324_s29 }
  0x14   : > { %564 = vmatpush.msra.mxu0 %v389_v2 }
  0x15   : > { %1326 = vmatpush.msra.mxu3 %v389_v2 }
  0x16   : > { %565 = vmatpush.msra.mxu0 %v388_v1 }
  0x17   : > { %1327 = vmatpush.msra.mxu3 %v388_v1 }
  0x18   : > { %566 = vmatpush.msra.mxu0 %v387_v3 }
  0x19   : > { %485 = vrot.lane.b32.xlu0 %v389_v2, %s1403_s11  ;;  %481 = vrot.lane.b32.xlu1 %v387_v3, %s1403_s11 }
  0x1a   : > { %468 = vrot.lane.b32.xlu2 %v389_v2, %s1404_s12  ;;  %1328 = vmatpush.msra.mxu3 %v387_v3 }
  0x21   : > { %466 = vrot.lane.b32.xlu0 %v388_v1, %s1404_s12  ;;  %464 = vrot.lane.b32.xlu1 %v387_v3, %s1404_s12 }
  0x22   : > { %453 = vrot.lane.b32.xlu2 %v390_v0, %s1405_s13 }
  0x29   : > { %451 = vrot.lane.b32.xlu0 %v389_v2, %s1405_s13  ;;  %449 = vrot.lane.b32.xlu1 %v388_v1, %s1405_s13 }
  0x2a   : > { %447 = vrot.lane.b32.xlu2 %v387_v3, %s1405_s13  ;;  %s1410_s13 = smov 48  }
  0x31   : > { %435 = vrot.lane.b32.xlu0 %v390_v0, %s1406_s14  ;;  %433 = vrot.lane.b32.xlu1 %v389_v2, %s1406_s14 }
  0x32   : > { %431 = vrot.lane.b32.xlu2 %v388_v1, %s1406_s14 }
  0x39   : > { %429 = vrot.lane.b32.xlu0 %v387_v3, %s1406_s14  ;;  %418 = vrot.lane.b32.xlu1 %v390_v0, %s1407_s15  ;;  %s1411_s14 = smov 32  }
  0x3a   : > { %416 = vrot.lane.b32.xlu2 %v389_v2, %s1407_s15 }
  0x41   : > { %414 = vrot.lane.b32.xlu0 %v388_v1, %s1407_s15  ;;  %412 = vrot.lane.b32.xlu1 %v387_v3, %s1407_s15  ;;  %s1412_s15 = smov 16  }
  0x42   : > { %401 = vrot.lane.b32.xlu2 %v390_v0, %s1408_s16 }
  0x49   : > { %399 = vrot.lane.b32.xlu0 %v389_v2, %s1408_s16  ;;  %397 = vrot.lane.b32.xlu1 %v388_v1, %s1408_s16 }
  0x4a   : > { %395 = vrot.lane.b32.xlu2 %v387_v3, %s1408_s16  ;;  %s1413_s16 = smov 80  }
  0x51   : > { %530 = vperm.xlu1 %1365, %v377_v39   ;;  %535 = vperm.xlu0 %1364, %v378_v58  }
  0x52   : > { %525 = vperm.xlu2 %1366, %v376_v59  }
  0x59   : > { %520 = vperm.xlu1 %1365, %v375_v49  }
  0x5a   : > { %515 = vperm.xlu2 %1366, %v374_v5  }
  0x61   : > { %505 = vperm.xlu1 %1365, %v372_v60  }
  0x6c   : > { %v471_v4 = vpop.permute.xlu2 %470 }
  0x6d   : > { %v480_v18 = vmul.f32 %v476_v16, %v471_v4  ;;  %v373_v4 = vld [vmem:[%s2152_s4 + $0x10] sm:$0xff] }
  0x6e   : > { %510 = vperm.xlu0 %1364, %v373_v4  }
  0x74   : > { %v469_v6 = vpop.permute.xlu2 %468 }
  0x75   : > { %v479_v22 = vmul.f32 %v476_v16, %v469_v6 }
  0x7c   : > { %v454_v11 = vpop.permute.xlu2 %453 }
  0x7d   : > { %v463_v26 = vmul.f32 %v459_v24, %v454_v11  ;;  %v357_v11 = vld [vmem:[%s2151_s3 + $0x10] sm:$0xff] }
  0x83   : > { %v488_v8 = vpop.permute.xlu0 %487  ;;  %v484_v9 = vpop.permute.xlu1 %483 }
  0x84   : > { %v497_v10 = vmul.f32 %v493_v7, %v488_v8  ;;  %v495_v15 = vmul.f32 %v493_v7, %v484_v9  ;;  %v448_v19 = vpop.permute.xlu2 %447  ;;  %v365_v8 = vld [vmem:[%s2151_s3 + $0x50] sm:$0xff]  ;;  %v364_v9 = vld [vmem:[%s2151_s3 + $0x48] sm:$0xff] }
  0x85   : > { %v460_v32 = vmul.f32 %v459_v24, %v448_v19  ;;  %v363_v19 = vld [vmem:[%s2151_s3 + $0x40] sm:$0xff] }
  0x86   : > { %608 = vmatpush.msra.mxu1 %v497_v10  ;;  %v371_v10 = vld [vmem:[%s2152_s4] sm:$0xff] }
  0x87   : > { %500 = vperm.xlu2 %1366, %v371_v10  }
  0x8b   : > { %v486_v12 = vpop.permute.xlu0 %485  ;;  %v482_v13 = vpop.permute.xlu1 %481 }
  0x8c   : > { %v496_v14 = vmul.f32 %v493_v7, %v486_v12  ;;  %v494_v17 = vmul.f32 %v493_v7, %v482_v13  ;;  %v432_v31 = vpop.permute.xlu2 %431  ;;  %v355_v7 = vld [vmem:[%s2151_s3] sm:$0xff]  ;;  %v366_v13 = vld [vmem:[%s2151_s3 + $0x58] sm:$0xff] }
  0x8d   : > { %v444_v41 = vmul.f32 %v442_v33, %v432_v31  ;;  %v367_v12 = vld [vmem:[%s2151_s3 + $0x60] sm:$0xff] }
  0x8e   : > { %609 = vmatpush.msra.mxu1 %v496_v14  ;;  %v359_v14 = vld [vmem:[%s2151_s3 + $0x20] sm:$0xff] }
  0x90   : > { %610 = vmatpush.msra.mxu1 %v495_v15  ;;  %v369_v15 = vld [vmem:[%s2151_s3 + $0x70] sm:$0xff] }
  0x92   : > { %611 = vmatpush.msra.mxu1 %v494_v17  ;;  %v361_v17 = vld [vmem:[%s2151_s3 + $0x30] sm:$0xff] }
  0x93   : > { %v467_v20 = vpop.permute.xlu0 %466  ;;  %v465_v21 = vpop.permute.xlu1 %464 }
  0x94   : > { %612 = vmatpush.msra.mxu1 %v480_v18  ;;  %v478_v23 = vmul.f32 %v476_v16, %v467_v20  ;;  %v477_v25 = vmul.f32 %v476_v16, %v465_v21  ;;  %v417_v42 = vpop.permute.xlu2 %416  ;;  %v368_v16 = vld [vmem:[%s2151_s3 + $0x68] sm:$0xff]  ;;  %v370_v18 = vld [vmem:[%s2151_s3 + $0x78] sm:$0xff] }
  0x95   : > { %v427_v50 = vmul.f32 %v424_v44, %v417_v42 }
  0x96   : > { %613 = vmatpush.msra.mxu1 %v479_v22 }
  0x98   : > { %614 = vmatpush.msra.mxu1 %v478_v23 }
  0x9a   : > { %615 = vmatpush.msra.mxu1 %v477_v25 }
  0x9b   : > { %v452_v27 = vpop.permute.xlu0 %451  ;;  %v450_v28 = vpop.permute.xlu1 %449 }
  0x9c   : > { %v462_v29 = vmul.f32 %v459_v24, %v452_v27  ;;  %616 = vmatpush.msra.mxu1 %v463_v26  ;;  %v461_v30 = vmul.f32 %v459_v24, %v450_v28  ;;  %v402_v52 = vpop.permute.xlu2 %401 }
  0x9d   : > { %v411_v61 = vmul.f32 %v407_v53, %v402_v52 }
  0x9e   : > { %617 = vmatpush.msra.mxu1 %v462_v29 }
  0xa0   : > { %618 = vmatpush.msra.mxu1 %v461_v30 }
  0xa2   : > { %619 = vmatpush.msra.mxu1 %v460_v32 }
  0xa3   : > { %v436_v35 = vpop.permute.xlu0 %435  ;;  %1304 = vmatmul.msk.f32.vlgmr.msra.gmra.mxu1 %vm538_vm0, %v356_v34  ;;  %v434_v36 = vpop.permute.xlu1 %433 }
  0xa4   : > { %v446_v37 = vmul.f32 %v442_v33, %v436_v35  ;;  %v445_v38 = vmul.f32 %v442_v33, %v434_v36  ;;  %v396_v63 = vpop.permute.xlu2 %395 }
  0xa5   : > { %v408_v6 = vmul.f32 %v407_v53, %v396_v63 }
  0xa6   : > { %567 = vmatpush.msra.mxu0 %v446_v37  ;;  %1329 = vmatpush.msra.mxu3 %v446_v37 }
  0xa8   : > { %568 = vmatpush.msra.mxu0 %v445_v38  ;;  %1330 = vmatpush.msra.mxu3 %v445_v38 }
  0xaa   : > { %569 = vmatpush.msra.mxu0 %v444_v41  ;;  %1331 = vmatpush.msra.mxu3 %v444_v41 }
  0xab   : > { %v430_v45 = vpop.permute.xlu0 %429  ;;  %1305 = vmatmul.msk.f32.gmra.mxu1 %vm538_vm0, %v358_v43  ;;  %v419_v46 = vpop.permute.xlu1 %418 }
  0xac   : > { %v443_v47 = vmul.f32 %v442_v33, %v430_v45  ;;  %v428_v48 = vmul.f32 %v424_v44, %v419_v46  ;;  %v526_v27 = vpop.permute.xlu2 %525 }
  0xae   : > { %570 = vmatpush.msra.mxu0 %v443_v47  ;;  %1332 = vmatpush.msra.mxu3 %v443_v47 }
  0xb0   : > { %571 = vmatpush.msra.mxu0 %v428_v48  ;;  %1333 = vmatpush.msra.mxu3 %v428_v48 }
  0xb2   : > { %572 = vmatpush.msra.mxu0 %v427_v50  ;;  %1334 = vmatpush.msra.mxu3 %v427_v50 }
  0xb3   : > { %v415_v54 = vpop.permute.xlu0 %414  ;;  %1306 = vmatmul.msk.f32.gmra.mxu1 %vm538_vm0, %v360_v51  ;;  %v413_v55 = vpop.permute.xlu1 %412 }
  0xb4   : > { %v426_v56 = vmul.f32 %v424_v44, %v415_v54  ;;  %v425_v57 = vmul.f32 %v424_v44, %v413_v55  ;;  %v516_v34 = vpop.permute.xlu2 %515 }
  0xb6   : > { %573 = vmatpush.msra.mxu0 %v426_v56  ;;  %1335 = vmatpush.msra.mxu3 %v426_v56 }
  0xb8   : > { %574 = vmatpush.msra.mxu0 %v425_v57  ;;  %1336 = vmatpush.msra.mxu3 %v425_v57 }
  0xba   : > { %575 = vmatpush.msra.mxu0 %v411_v61  ;;  %1337 = vmatpush.msra.mxu3 %v411_v61 }
  0xbb   : > { %v400_v0 = vpop.permute.xlu0 %399  ;;  %1307 = vmatmul.msk.f32.gmra.mxu1 %vm538_vm0, %v362_v62  ;;  %v398_v1 = vpop.permute.xlu1 %397 }
  0xbc   : > { %v410_v2 = vmul.f32 %v407_v53, %v400_v0  ;;  %v409_v3 = vmul.f32 %v407_v53, %v398_v1 }
  0xbe   : > { %576 = vmatpush.msra.mxu0 %v410_v2  ;;  %1338 = vmatpush.msra.mxu3 %v410_v2 }
  0xc0   : > { %577 = vmatpush.msra.mxu0 %v409_v3  ;;  %1339 = vmatpush.msra.mxu3 %v409_v3 }
  0xc2   : > { %578 = vmatpush.msra.mxu0 %v408_v6  ;;  %1340 = vmatpush.msra.mxu3 %v408_v6 }
  0xc3   : > { %579 = vmatmul.f32.vlgmr.msra.gmra.mxu0 %v355_v7  ;;  %594 = vmatmul.f32.vlgmr.msra.gmra.mxu3 %v365_v8  ;;  %v531_v32 = vpop.permute.xlu1 %530  ;;  %v536_v56 = vpop.permute.xlu0 %535 }
  0xc4   : > { %1308 = vmatmul.msk.f32.gmra.mxu1 %vm538_vm0, %v364_v9 }
  0xcb   : > { %582 = vmatmul.f32.gmra.mxu0 %v357_v11  ;;  %597 = vmatmul.f32.gmra.mxu3 %v367_v12  ;;  %v521_v40 = vpop.permute.xlu1 %520 }
  0xcc   : > { %1309 = vmatmul.msk.f32.gmra.mxu1 %vm538_vm0, %v366_v13 }
  0xd3   : > { %585 = vmatmul.f32.gmra.mxu0 %v359_v14  ;;  %600 = vmatmul.f32.gmra.mxu3 %v369_v15  ;;  %v506_v3 = vpop.permute.xlu1 %505 }
  0xd4   : > { %1310 = vmatmul.msk.f32.gmra.mxu1 %vm538_vm0, %v368_v16 }
  0xdb   : > { %588 = vmatmul.f32.gmra.mxu0 %v361_v17 }
  0xdc   : > { %1311 = vmatmul.msk.f32.gmra.mxu1 %vm538_vm0, %v370_v18 }
  0xe1   : > { %v501_v52 = vpop.permute.xlu2 %500 }
  0xe3   : > { %591 = vmatmul.f32.gmra.mxu0 %v363_v19 }
 0x120   : > { %v621_v20 = vpop.f32.mrf.mxu1 }
 0x128   : > { %v1575_v21 = vpop.f32.mrf.mxu1 }
 0x130   : > { %v1577_v22 = vpop.f32.mrf.mxu1 }
 0x138   : > { %v630_v23 = vpop.f32.mrf.mxu1 }
 0x140   : > { %v580_v24 = vpop.f32.mrf.mxu0 }
 0x141   : > { %v633_v26 = vpop.f32.mrf.mxu1  ;;  %v581_v57 = vadd.f32 %v580_v24, %v501_v52 }
 0x143   : > { %v622_v62 = vadd.f32 %v621_v20, %v581_v57 }
 0x146   : > { %v595_v28 = vpop.f32.mrf.mxu3 }
 0x147   : > { %v596_v30 = vadd.f32 %v595_v28, %v526_v27 }
 0x148   : > { %v583_v25 = vpop.f32.mrf.mxu0 }
 0x149   : > { %v636_v31 = vpop.f32.mrf.mxu1  ;;  %v584_v7 = vadd.f32 %v583_v25, %v506_v3 }
 0x14a   : > { %v637_v33 = vadd.f32 %v636_v31, %v596_v30 }
 0x14b   : > { %v625_v14 = vadd.f32 %v1575_v21, %v584_v7 }
 0x14c   : > { %v1313_v37 = vmul.f32 -1.442695, %v637_v33 }
 0x14e   : > { %1367 = vpow2.f32 %v1313_v37  ;;  %v598_v39 = vpop.f32.mrf.mxu3 }
 0x14f   : > { %v599_v43 = vadd.f32 %v598_v39, %v531_v32  ;;  %v511_v32 = vpop.permute.xlu0 %510 }
 0x150   : > { %v1579_v29 = vpop.f32.mrf.mxu0 }
 0x151   : > { %v639_v44 = vpop.f32.mrf.mxu1 }
 0x152   : > { %v640_v48 = vadd.f32 %v639_v44, %v599_v43 }
 0x154   : > { %v1368_v46 = vpop.eup %1367  ;;  %v1314_v50 = vmul.f32 -1.442695, %v640_v48 }
 0x155   : > { %v662_v49 = vadd.f32 1.0, %v1368_v46 }
 0x156   : > { %v601_v53 = vpop.f32.mrf.mxu3 }
 0x157   : > { %v602_v58 = vadd.f32 %v601_v53, %v536_v56  ;;  %vm685_vm2 = vweird.f32 %v662_v49  ;;  %v691_v13 = vand.u32 2147483648, %v662_v49  ;;  %v689_v18 = vand.u32 2147483647, %v662_v49 }
 0x158   : > { %v589_v35 = vpop.f32.mrf.mxu0 }
 0x159   : > { %v590_v36 = vadd.f32 %v589_v35, %v516_v34  ;;  %v642_v59 = vpop.f32.mrf.mxu1  ;;  %vm690_vm8 = vcmp.eq.f32.partialorder %v689_v18, 8.507059e+37 }
 0x15a   : > { %v643_v63 = vadd.f32 %v642_v59, %v602_v58  ;;  %v383_v58 = vld [vmem:[%s2154_s6] sm:$0xff]  ;;  %v386_v59 = vld [vmem:[%s2154_s6 + $0x18] sm:$0xff] }
 0x15b   : > { %v1581_v38 = vadd.f32 %v630_v23, %v590_v36  ;;  %v587_v36 = vadd.f32 %v1579_v29, %v511_v32 }
 0x15c   : > { %v1315_v5 = vmul.f32 -1.442695, %v643_v63 }
 0x15d   : > { %v628_v39 = vadd.f32 %v1577_v22, %v587_v36 }
 0x160   : > { %v592_v41 = vpop.f32.mrf.mxu0 }
 0x161   : > { %v593_v42 = vadd.f32 %v592_v41, %v521_v40 }
 0x163   : > { %v634_v45 = vadd.f32 %v633_v26, %v593_v42  ;;  %v692_v26 = vor.u32 1.1754944e-38, %v691_v13 }
 0x165   : > { %v1312_v47 = vmul.f32 -1.442695, %v634_v45 }
 0x167   : > { %1369 = vpow2.f32 %v1312_v47 }
 0x168   : > { %1371 = vrcp.f32 %v662_v49 }
 0x169   : > { %1373 = vpow2.f32 %v1314_v50 }
 0x16d   : > { %v1370_v51 = vpop.eup %1369 }
 0x16e   : > { %v661_v54 = vadd.f32 1.0, %v1370_v51  ;;  %v1372_v55 = vpop.eup %1371 }
 0x16f   : > { %v1374_v60 = vpop.eup %1373  ;;  %v681_v61 = vmul.f32 %v1372_v55, %v662_v49  ;;  %vm686_vm3 = vweird.f32 %v1372_v55 }
 0x170   : > { %1375 = vrcp.f32 %v661_v54  ;;  %v1583_v1 = vadd.f32 1.0, %v1374_v60  ;;  %v676_v8 = vand.u32 2147483648, %v661_v54  ;;  %v674_v11 = vand.u32 2147483647, %v661_v54  ;;  %vm1588_vm7 = vmor %vm685_vm2, %vm686_vm3  ;;  %v385_v60 = vld [vmem:[%s2154_s6 + $0x10] sm:$0xff] }
 0x171   : > { %v682_v2 = vsub.f32 1.0, %v681_v61  ;;  %1377 = vtanh.f32 %v622_v62  ;;  %vm670_vm4 = vweird.f32 %v661_v54 }
 0x172   : > { %1379 = vrcp.f32 %v1583_v1  ;;  %v677_v15 = vor.u32 1.1754944e-38, %v676_v8  ;;  %vm675_vm6 = vcmp.eq.f32.partialorder %v674_v11, 8.507059e+37  ;;  %vm700_vm9 = vweird.f32 %v1583_v1 }
 0x173   : > { %v683_v9 = vmul.f32 %v1372_v55, %v682_v2  ;;  %1381 = vpow2.f32 %v1315_v5  ;;  %v706_v41 = vand.u32 2147483648, %v1583_v1  ;;  %v704_v42 = vand.u32 2147483647, %v1583_v1 }
 0x174   : > { %1383 = vtanh.f32 %v625_v14 }
 0x175   : > { %v684_v17 = vadd.f32 %v1372_v55, %v683_v9  ;;  %v707_v22 = vor.u32 1.1754944e-38, %v706_v41  ;;  %vm705_vm12 = vcmp.eq.f32.partialorder %v704_v42, 8.507059e+37 }
 0x176   : > { %v1376_v0 = vpop.eup %1375 }
 0x177   : > { %v666_v4 = vmul.f32 %v1376_v0, %v661_v54  ;;  %vm671_vm1 = vweird.f32 %v1376_v0  ;;  %v1378_v16 = vpop.eup %1377  ;;  %v688_v21 = vsel %vm1588_vm7, %v1372_v55, %v684_v17 }
 0x178   : > { %vm672_vm5 = vmor %vm670_vm4, %vm671_vm1  ;;  %v1380_v20 = vpop.eup %1379  ;;  %v693_v30 = vsel %vm690_vm8, %v692_v26, %v688_v21 }
 0x179   : > { %v667_v6 = vsub.f32 1.0, %v666_v4  ;;  %v1382_v27 = vpop.eup %1381  ;;  %v696_v28 = vmul.f32 %v1380_v20, %v1583_v1  ;;  %vm701_vm10 = vweird.f32 %v1380_v20 }
 0x17a   : > { %v664_v31 = vadd.f32 1.0, %v1382_v27  ;;  %v1384_v34 = vpop.eup %1383  ;;  %vm702_vm11 = vmor %vm700_vm9, %vm701_vm10 }
 0x17b   : > { %v668_v10 = vmul.f32 %v1376_v0, %v667_v6  ;;  %v697_v33 = vsub.f32 1.0, %v696_v28  ;;  %v1603_v35 = vmul.f32 %v1384_v34, %v693_v30 }
 0x17c   : > { %1385 = vrcp.f32 %v664_v31  ;;  %vm715_vm13 = vweird.f32 %v664_v31  ;;  %v721_v50 = vand.u32 2147483648, %v664_v31  ;;  %v719_v52 = vand.u32 2147483647, %v664_v31 }
 0x17d   : > { %v669_v12 = vadd.f32 %v1376_v0, %v668_v10  ;;  %2178 = vst [vmem:[#allocation3_spill] sm:$0xff] %v1603_v35  ;;  %v698_v37 = vmul.f32 %v1380_v20, %v697_v33  ;;  %1387 = vtanh.f32 %v628_v39 }
 0x17e   : > { %1389 = vtanh.f32 %v1581_v38  ;;  %v722_v53 = vor.u32 1.1754944e-38, %v721_v50  ;;  %vm720_vm1 = vcmp.eq.f32.partialorder %v719_v52, 8.507059e+37  ;;  %v384_v38 = vld [vmem:[%s2154_s6 + $0x8] sm:$0xff] }
 0x17f   : > { %v673_v19 = vsel %vm672_vm5, %v1376_v0, %v669_v12  ;;  %v699_v40 = vadd.f32 %v1380_v20, %v698_v37 }
 0x180   : > { %v678_v24 = vsel %vm675_vm6, %v677_v15, %v673_v19 }
 0x181   : > { %v1592_v25 = vmul.f32 %v1378_v16, %v678_v24  ;;  %v703_v43 = vsel %vm702_vm11, %v1380_v20, %v699_v40 }
 0x182   : > { %v1386_v29 = vpop.eup %1385  ;;  %v708_v45 = vsel %vm705_vm12, %v707_v22, %v703_v43 }
 0x183   : > { %2177 = vst [vmem:[#allocation2_spill] sm:$0xff] %v1592_v25  ;;  %793 = vrot.lane.b32.xlu2 %v1592_v25, %s1410_s13  ;;  %763 = vrot.lane.b32.xlu1 %v1592_v25, %s1411_s14  ;;  %v711_v44 = vmul.f32 %v1386_v29, %v664_v31  ;;  %v1388_v47 = vpop.eup %1387  ;;  %vm716_vm14 = vweird.f32 %v1386_v29 }
 0x184   : > { %733 = vrot.lane.b32.xlu0 %v1592_v25, %s1412_s15  ;;  %v1622_v48 = vmul.f32 %v1388_v47, %v708_v45  ;;  %vm717_vm15 = vmor %vm715_vm13, %vm716_vm14  ;;  %v1390_v56 = vpop.eup %1389 }
 0x185   : > { %v712_v46 = vsub.f32 1.0, %v711_v44 }
 0x186   : > { %2179 = vst [vmem:[#allocation4_spill] sm:$0xff] %v1622_v48 }
 0x187   : > { %v713_v49 = vmul.f32 %v1386_v29, %v712_v46 }
 0x189   : > { %v714_v51 = vadd.f32 %v1386_v29, %v713_v49 }
 0x18b   : > { %735 = vrot.lane.b32.xlu2 %v1603_v35, %s1412_s15  ;;  %853 = vrot.lane.b32.xlu1 %v1592_v25, %s1413_s16  ;;  %v718_v54 = vsel %vm717_vm15, %v1386_v29, %v714_v51 }
 0x18c   : > { %823 = vrot.lane.b32.xlu0 %v1592_v25, %s1414_s17  ;;  %v723_v55 = vsel %vm720_vm1, %v722_v53, %v718_v54 }
 0x18d   : > { %v1637_v57 = vmul.f32 %v1390_v56, %v723_v55 }
 0x18f   : > { %2180 = vst [vmem:[#allocation5_spill] sm:$0xff] %v1637_v57 }
 0x193   : > { %795 = vrot.lane.b32.xlu2 %v1603_v35, %s1410_s13  ;;  %855 = vrot.lane.b32.xlu1 %v1603_v35, %s1413_s16 }
 0x194   : > { %765 = vrot.lane.b32.xlu0 %v1603_v35, %s1411_s14 }
 0x19b   : > { %885 = vrot.lane.b32.xlu2 %v1603_v35, %s1415_s18  ;;  %797 = vrot.lane.b32.xlu1 %v1622_v48, %s1410_s13 }
 0x19c   : > { %825 = vrot.lane.b32.xlu0 %v1603_v35, %s1414_s17 }
 0x1a3   : > { %737 = vrot.lane.b32.xlu2 %v1622_v48, %s1412_s15  ;;  %857 = vrot.lane.b32.xlu1 %v1622_v48, %s1413_s16 }
 0x1a4   : > { %767 = vrot.lane.b32.xlu0 %v1622_v48, %s1411_s14 }
 0x1ab   : > { %887 = vrot.lane.b32.xlu2 %v1622_v48, %s1415_s18  ;;  %769 = vrot.lane.b32.xlu1 %v1637_v57, %s1411_s14 }
 0x1ac   : > { %827 = vrot.lane.b32.xlu0 %v1622_v48, %s1414_s17 }
 0x1b3   : > { %829 = vrot.lane.b32.xlu2 %v1637_v57, %s1414_s17  ;;  %799 = vrot.lane.b32.xlu1 %v1637_v57, %s1410_s13  ;;  %s1683_s13 = scalar_lea.vmem %s2149_s1, %s1341_s9 }
 0x1b4   : > { %917 = vrot.lane.b32.xlu0 %v1622_v48, %s1416_s19  ;;  %v341_v0 = vld [vmem:[%s1683_s13 + $0x2] sm:$0x3]  ;;  %v342_v1 = vld [vmem:[%s1683_s13 + $0x4] sm:$0x3]  ;;  %v340_v2 = vld [vmem:[%s1683_s13] sm:$0x3] }
 0x1b5   : > { %v1688_v3 = vperm.slane %v341_v0, 0  ;;  %v1690_v4 = vperm.slane %v342_v1, 0  ;;  %v1692_v5 = vperm.slane %v340_v2, 0  ;;  %v343_v13 = vld [vmem:[%s1683_s13 + $0x6] sm:$0x3]  ;;  %v1748_v44 = vperm.slane %v341_v0, 1 }
 0x1b6   : > { %v1707_v15 = vperm.slane %v343_v13, 0  ;;  %v347_v32 = vld [vmem:[%s1683_s13 + $0xe] sm:$0x3]  ;;  %v1741_v39 = vld [vmem:[%s1683_s13 + $0x8] sm:$0x3]  ;;  %v1773_v56 = vperm.slane %v340_v2, 1 }
 0x1b7   : > { %v943_v37 = vperm.slane %v347_v32, 0  ;;  %v952_v40 = vperm.slane %v347_v32, 1  ;;  %v345_v41 = vld [vmem:[%s1683_s13 + $0xa] sm:$0x3]  ;;  %v1751_v22 = vperm.slane %v1741_v39, 0 }
 0x1b8   : > { %v1757_v49 = vld [vmem:[%s1683_s13 + $0xc] sm:$0x3]  ;;  %v350_v54 = vld [vmem:[%s1683_s13 + $0x14] sm:$0x3]  ;;  %v348_v55 = vld [vmem:[%s1683_s13 + $0x10] sm:$0x3] }
 0x1b9   : > { %v945_v47 = vmul.f32 %v943_v37, %v1603_v35  ;;  %v1760_v50 = vmul.f32 %v952_v40, %v1603_v35  ;;  %v1763_v51 = vmul.f32 %v943_v37, %v1622_v48  ;;  %v1766_v52 = vmul.f32 %v952_v40, %v1622_v48  ;;  %v349_v2 = vld [vmem:[%s1683_s13 + $0x12] sm:$0x3] }
 0x1ba   : > { %v1769_v53 = vmul.f32 %v943_v37, %v1637_v57  ;;  %v1784_v0 = vmul.f32 %v952_v40, %v1637_v57  ;;  %v1805_v32 = vperm.slane %v348_v55, 0 }
 0x1bb   : > { %889 = vrot.lane.b32.xlu2 %v1637_v57, %s1415_s18  ;;  %859 = vrot.lane.b32.xlu1 %v1637_v57, %s1413_s16  ;;  %2186 = vst [vmem:[#allocation11_spill] sm:$0xff] %v1760_v50 }
 0x1bc   : > { %739 = vrot.lane.b32.xlu0 %v1637_v57, %s1412_s15  ;;  %2187 = vst [vmem:[#allocation12_spill] sm:$0xff] %v1763_v51 }
 0x1bd   : > { %2188 = vst [vmem:[#allocation13_spill] sm:$0xff] %v1769_v53 }
 0x1be   : > { %2189 = vst [vmem:[#allocation14_spill] sm:$0xff] %v1784_v0 }
 0x1c3   : > { %915 = vrot.lane.b32.xlu2 %v1603_v35, %s1416_s19  ;;  %883 = vrot.lane.b32.xlu1 %v1592_v25, %s1415_s18 }
 0x1c4   : > { %919 = vrot.lane.b32.xlu0 %v1637_v57, %s1416_s19 }
 0x1cb   : > { %1094 = vperm.xlu2 %1366, %v384_v38   ;;  %1089 = vperm.xlu1 %1365, %v383_v58   ;;  %v1775_v38 = vperm.slane %v345_v41, 0 }
 0x1cc   : > { %913 = vrot.lane.b32.xlu0 %v1592_v25, %s1416_s19 }
 0x1d3   : > { %1104 = vperm.xlu1 %1365, %v386_v59  }
 0x1d4   : > { %1099 = vperm.xlu0 %1364, %v385_v60   ;;  %v1781_v60 = vperm.slane %v342_v1, 1  ;;  %v1798_v1 = vperm.slane %v1757_v49, 0 }
 0x1dd   : > { %v1673_v61 = vpop.permute.xlu2 %793 }
 0x1de   : > { %v806_v11 = vmul.f32 %v1690_v4, %v1673_v61 }
 0x1e5   : > { %v1675_v62 = vpop.permute.xlu2 %735 }
 0x1e6   : > { %v747_v30 = vmul.f32 %v1692_v5, %v1675_v62 }
 0x1ed   : > { %v1678_v63 = vpop.permute.xlu2 %795 }
 0x1ee   : > { %v807_v34 = vmul.f32 %v1690_v4, %v1678_v63 }
 0x1f5   : > { %v1694_v6 = vpop.permute.xlu2 %885  ;;  %v1696_v7 = vpop.permute.xlu1 %763 }
 0x1f6   : > { %2181 = vst [vmem:[#allocation6_spill] sm:$0xff] %v1694_v6  ;;  %v776_v8 = vmul.f32 %v1688_v3, %v1696_v7  ;;  %v1700_v9 = vpop.permute.xlu0 %733  ;;  %v785_v50 = vmul.f32 %v1748_v44, %v1696_v7 }
 0x1f7   : > { %v746_v10 = vmul.f32 %v1692_v5, %v1700_v9 }
 0x1f9   : > { %v780_v12 = vadd.f32 %v776_v8, %v746_v10  ;;  %v1787_v8 = vmul.f32 %v943_v37, %v1592_v25  ;;  %v1790_v10 = vmul.f32 %v952_v40, %v1592_v25  ;;  %v897_v37 = vmul.f32 %v1775_v38, %v1694_v6 }
 0x1fb   : > { %v810_v14 = vadd.f32 %v806_v11, %v780_v12  ;;  %2190 = vst [vmem:[#allocation15_spill] sm:$0xff] %v1787_v8 }
 0x1fc   : > { %2191 = vst [vmem:[#allocation16_spill] sm:$0xff] %v1790_v10  ;;  %v351_v10 = vld [vmem:[%s1683_s13 + $0x16] sm:$0x3] }
 0x1fd   : > { %v1709_v16 = vpop.permute.xlu2 %737  ;;  %v1711_v17 = vpop.permute.xlu1 %853 }
 0x1fe   : > { %v1713_v18 = vpop.permute.xlu0 %823  ;;  %v757_v11 = vmul.f32 %v1773_v56, %v1709_v16 }
 0x1ff   : > { %v836_v19 = vmul.f32 %v1707_v15, %v1713_v18 }
 0x201   : > { %v1717_v20 = vadd.f32 %v836_v19, %v810_v14  ;;  %v353_v19 = vld [vmem:[%s1683_s13 + $0x1a] sm:$0x3] }
 0x202   : > { %v1825_v25 = vperm.slane %v353_v19, 1 }
 0x203   : > { %2182 = vst [vmem:[#allocation7_spill] sm:$0xff] %v1717_v20 }
 0x205   : > { %v1719_v23 = vpop.permute.xlu2 %887  ;;  %v1721_v24 = vpop.permute.xlu1 %855 }
 0x206   : > { %v1723_v26 = vpop.permute.xlu0 %765  ;;  %v867_v58 = vmul.f32 %v1751_v22, %v1721_v24 }
 0x207   : > { %v777_v27 = vmul.f32 %v1688_v3, %v1723_v26  ;;  %v786_v12 = vmul.f32 %v1748_v44, %v1723_v26 }
 0x209   : > { %v781_v33 = vadd.f32 %v777_v27, %v747_v30  ;;  %v1801_v27 = vperm.slane %v350_v54, 0  ;;  %v1803_v30 = vperm.slane %v350_v54, 1  ;;  %v1819_v54 = vperm.slane %v343_v13, 1 }
 0x20a   : > { %v1835_v13 = vmul.f32 %v1781_v60, %v1673_v61 }
 0x20b   : > { %v811_v29 = vadd.f32 %v807_v34, %v781_v33  ;;  %2192 = vst [vmem:[#allocation17_spill] sm:$0xff] %v1801_v27  ;;  %v1807_v33 = vperm.slane %v348_v55, 1  ;;  %v756_v34 = vmul.f32 %v1773_v56, %v1675_v62  ;;  %v1851_v53 = vmul.f32 %v1801_v27, %v1673_v61 }
 0x20c   : > { %v1855_v51 = vmul.f32 %v1803_v30, %v1673_v61  ;;  %v1870_v61 = vperm.slane %v351_v10, 1 }
 0x20d   : > { %v1727_v21 = vpop.permute.xlu2 %829  ;;  %v1729_v28 = vpop.permute.xlu1 %797  ;;  %2195 = vst [vmem:[#allocation20_spill] sm:$0xff] %v1851_v53  ;;  %v1868_v53 = vperm.slane %v351_v10, 0 }
 0x20e   : > { %2183 = vst [vmem:[#allocation8_spill] sm:$0xff] %v1727_v21  ;;  %v1733_v31 = vpop.permute.xlu0 %825  ;;  %v817_v35 = vmul.f32 %v1781_v60, %v1729_v28 }
 0x20f   : > { %v837_v36 = vmul.f32 %v1707_v15, %v1733_v31  ;;  %2196 = vst [vmem:[#allocation21_spill] sm:$0xff] %v1855_v51 }
 0x211   : > { %v841_v45 = vadd.f32 %v837_v36, %v811_v29  ;;  %v1811_v36 = vperm.slane %v345_v41, 1  ;;  %v1815_v29 = vperm.slane %v349_v2, 0  ;;  %v790_v41 = vadd.f32 %v786_v12, %v756_v34  ;;  %v352_v34 = vld [vmem:[%s1683_s13 + $0x18] sm:$0x3] }
 0x212   : > { %v1841_v12 = vperm.slane %v353_v19, 0  ;;  %v963_v19 = vmul.f32 %v1805_v32, %v1675_v62 }
 0x213   : > { %v871_v14 = vadd.f32 %v867_v58, %v841_v45  ;;  %v1817_v45 = vperm.slane %v349_v2, 1  ;;  %v816_v2 = vmul.f32 %v1781_v60, %v1678_v63 }
 0x214   : > { %2194 = vst [vmem:[#allocation19_spill] sm:$0xff] %v1841_v12  ;;  %v1860_v12 = vperm.slane %v1741_v39, 1 }
 0x215   : > { %v1744_v42 = vpop.permute.xlu2 %889  ;;  %v1746_v43 = vpop.permute.xlu1 %857  ;;  %v901_v48 = vadd.f32 %v897_v37, %v871_v14  ;;  %v846_v14 = vmul.f32 %v1819_v54, %v1733_v31  ;;  %v820_v20 = vadd.f32 %v816_v2, %v790_v41 }
 0x216   : > { %2184 = vst [vmem:[#allocation9_spill] sm:$0xff] %v1744_v42  ;;  %v1753_v46 = vpop.permute.xlu0 %767  ;;  %v748_v42 = vmul.f32 %v1692_v5, %v1709_v16 }
 0x217   : > { %2185 = vst [vmem:[#allocation10_spill] sm:$0xff] %v1753_v46  ;;  %v787_v59 = vmul.f32 %v1748_v44, %v1753_v46  ;;  %v778_v37 = vmul.f32 %v1688_v3, %v1753_v46  ;;  %v850_v51 = vadd.f32 %v846_v14, %v820_v20  ;;  %v877_v46 = vmul.f32 %v1860_v12, %v1746_v43 }
 0x218   : > { %v981_v20 = vmul.f32 %v1815_v29, %v1723_v26  ;;  %v1901_v14 = vmul.f32 %v1803_v30, %v1678_v63 }
 0x219   : > { %v791_v40 = vadd.f32 %v787_v59, %v757_v11  ;;  %v782_v39 = vadd.f32 %v778_v37, %v748_v42  ;;  %v808_v42 = vmul.f32 %v1690_v4, %v1729_v28  ;;  %v907_v37 = vmul.f32 %v1811_v36, %v1719_v23 }
 0x21a   : > { %2199 = vst [vmem:[#allocation24_spill] sm:$0xff] %v1901_v14 }
 0x21b   : > { %v821_v0 = vadd.f32 %v817_v35, %v791_v40  ;;  %v1864_v40 = vperm.slane %v352_v34, 0 }
 0x21d   : > { %v1821_v58 = vpop.permute.xlu2 %915  ;;  %v1823_v55 = vpop.permute.xlu1 %769 }
 0x21e   : > { %2193 = vst [vmem:[#allocation18_spill] sm:$0xff] %v1821_v58  ;;  %v927_v59 = vmul.f32 %v1798_v1, %v1821_v58  ;;  %v1831_v11 = vpop.permute.xlu0 %827 }
 0x21f   : > { %v847_v57 = vmul.f32 %v1819_v54, %v1831_v11  ;;  %v838_v10 = vmul.f32 %v1707_v15, %v1831_v11 }
 0x220   : > { %v931_v8 = vadd.f32 %v927_v59, %v901_v48  ;;  %v1866_v59 = vperm.slane %v352_v34, 1  ;;  %v1895_v34 = vmul.f32 %v1807_v33, %v1675_v62  ;;  %v906_v62 = vmul.f32 %v1811_v36, %v1694_v6 }
 0x221   : > { %v851_v35 = vadd.f32 %v847_v57, %v821_v0  ;;  %v755_v57 = vmul.f32 %v1773_v56, %v1700_v9  ;;  %v1881_v0 = vperm.slane %v1757_v49, 1  ;;  %v999_v49 = vmul.f32 %v1801_v27, %v1678_v63 }
 0x222   : > { %v949_v48 = vadd.f32 %v945_v47, %v931_v8  ;;  %2197 = vst [vmem:[#allocation22_spill] sm:$0xff] %v1866_v59  ;;  %v876_v47 = vmul.f32 %v1860_v12, %v1721_v24  ;;  %v1911_v59 = vmul.f32 %v1815_v29, %v1696_v7  ;;  %v1017_v63 = vmul.f32 %v1868_v53, %v1733_v31 }
 0x223   : > { %v881_v41 = vadd.f32 %v877_v46, %v851_v35  ;;  %v789_v27 = vadd.f32 %v785_v50, %v755_v57  ;;  %v936_v14 = vmul.f32 %v1881_v0, %v1821_v58  ;;  %v1927_v50 = vmul.f32 %v1807_v33, %v1700_v9 }
 0x224   : > { %v967_v21 = vadd.f32 %v963_v19, %v949_v48  ;;  %v880_v19 = vadd.f32 %v876_v47, %v850_v51  ;;  %v812_v48 = vadd.f32 %v808_v42, %v782_v39  ;;  %v1931_v57 = vmul.f32 %v1825_v25, %v1694_v6 }
 0x225   : > { %v1883_v8 = vpop.permute.xlu1 %799  ;;  %v911_v39 = vadd.f32 %v907_v37, %v881_v41  ;;  %v868_v42 = vmul.f32 %v1751_v22, %v1746_v43  ;;  %v973_v37 = vmul.f32 %v1807_v33, %v1709_v16  ;;  %v845_v6 = vmul.f32 %v1819_v54, %v1713_v18 }
 0x226   : > { %v1891_v2 = vpop.permute.xlu0 %917  ;;  %v985_v35 = vadd.f32 %v981_v20, %v967_v21  ;;  %v842_v51 = vadd.f32 %v838_v10, %v812_v48  ;;  %v1919_v21 = vmul.f32 %v1817_v45, %v1696_v7  ;;  %v1923_v20 = vmul.f32 %v1805_v32, %v1700_v9  ;;  %2200 = vst [vmem:[#allocation25_spill] sm:$0xff] %v1931_v57  ;;  %v2202_v57 = vld [vmem:[#allocation11_spill] sm:$0xff] }
 0x227   : > { %2198 = vst [vmem:[#allocation23_spill] sm:$0xff] %v1891_v2  ;;  %v937_v46 = vmul.f32 %v1881_v0, %v1891_v2  ;;  %v910_v10 = vadd.f32 %v906_v62, %v880_v19  ;;  %v1937_v7 = vmul.f32 %v1805_v32, %v1709_v16  ;;  %v866_v9 = vmul.f32 %v1751_v22, %v1711_v17 }
 0x228   : > { %v1003_v47 = vadd.f32 %v999_v49, %v985_v35  ;;  %v819_v48 = vadd.f32 %v1835_v13, %v789_v27  ;;  %v1035_v19 = vmul.f32 %v1864_v40, %v1721_v24  ;;  %v872_v62 = vadd.f32 %v868_v42, %v842_v51 }
 0x229   : > { %v941_v41 = vadd.f32 %v937_v46, %v911_v39  ;;  %v940_v46 = vadd.f32 %v936_v14, %v910_v10  ;;  %v779_v39 = vmul.f32 %v1688_v3, %v1823_v55  ;;  %v788_v16 = vmul.f32 %v1748_v44, %v1823_v55 }
 0x22a   : > { %v1021_v49 = vadd.f32 %v1017_v63, %v1003_v47  ;;  %v898_v13 = vmul.f32 %v1775_v38, %v1719_v23  ;;  %v928_v58 = vmul.f32 %v1798_v1, %v1891_v2  ;;  %v809_v3 = vmul.f32 %v1690_v4, %v1883_v8 }
 0x22b   : > { %v959_v14 = vadd.f32 %v1766_v52, %v941_v41  ;;  %v818_v44 = vmul.f32 %v1781_v60, %v1883_v8  ;;  %v1971_v10 = vmul.f32 %v1864_v40, %v1711_v17  ;;  %v958_v2 = vadd.f32 %v2202_v57, %v940_v46  ;;  %v2203_v41 = vld [vmem:[#allocation8_spill] sm:$0xff] }
 0x22c   : > { %v1961_v51 = vadd.f32 %v1035_v19, %v1021_v49  ;;  %v902_v52 = vadd.f32 %v898_v13, %v872_v62  ;;  %v839_v49 = vmul.f32 %v1707_v15, %v2203_v41  ;;  %v848_v4 = vmul.f32 %v1819_v54, %v2203_v41  ;;  %v2205_v54 = vld [vmem:[#allocation10_spill] sm:$0xff] }
 0x22d   : > { %v1944_v35 = vpop.permute.xlu1 %859  ;;  %v991_v13 = vmul.f32 %v1817_v45, %v2205_v54 }
 0x22e   : > { %v740_v63 = vpop.permute.xlu0 %739  ;;  %2201 = vst [vmem:[#allocation26_spill] sm:$0xff] %v1961_v51  ;;  %v977_v51 = vadd.f32 %v973_v37, %v959_v14  ;;  %v869_v57 = vmul.f32 %v1751_v22, %v1944_v35  ;;  %v878_v15 = vmul.f32 %v1860_v12, %v1944_v35  ;;  %v2207_v37 = vld [vmem:[#allocation9_spill] sm:$0xff] }
 0x22f   : > { %v749_v47 = vmul.f32 %v1692_v5, %v740_v63  ;;  %v758_v27 = vmul.f32 %v1773_v56, %v740_v63  ;;  %v875_v56 = vmul.f32 %v1860_v12, %v1711_v17  ;;  %v899_v22 = vmul.f32 %v1775_v38, %v2207_v37 }
 0x230   : > { %v908_v12 = vmul.f32 %v1811_v36, %v2207_v37 }
 0x231   : > { %v783_v5 = vadd.f32 %v779_v39, %v749_v47  ;;  %v792_v42 = vadd.f32 %v788_v16, %v758_v27  ;;  %v1979_v39 = vld [vmem:[%s1683_s13 + $0x1c] sm:$0x3]  ;;  %v849_v16 = vadd.f32 %v845_v6, %v819_v48  ;;  %v1983_v47 = vmul.f32 %v1868_v53, %v1713_v18  ;;  %v2206_v6 = vld [vmem:[#allocation7_spill] sm:$0xff] }
 0x232   : > { %2204 = vst [vmem:[#allocation11_spill] sm:$0xff] %v1979_v39  ;;  %v932_v27 = vadd.f32 %v928_v58, %v902_v52  ;;  %v870_v48 = vadd.f32 %v866_v9, %v2206_v6  ;;  %v1996_v58 = vperm.slane %v1979_v39, 1  ;;  %v1009_v39 = vmul.f32 %v1803_v30, %v1729_v28 }
 0x233   : > { %v813_v19 = vadd.f32 %v809_v3, %v783_v5  ;;  %v822_v60 = vadd.f32 %v818_v44, %v792_v42  ;;  %v976_v3 = vadd.f32 %v1895_v34, %v958_v2  ;;  %v990_v2 = vmul.f32 %v1817_v45, %v1723_v26  ;;  %v2208_v34 = vld [vmem:[#allocation12_spill] sm:$0xff] }
 0x234   : > { %v950_v9 = vadd.f32 %v2208_v34, %v932_v27  ;;  %v879_v52 = vadd.f32 %v875_v56, %v849_v16  ;;  %v982_v56 = vmul.f32 %v1815_v29, %v2205_v54  ;;  %v1027_v54 = vmul.f32 %v1870_v61, %v1831_v11  ;;  %v2211_v34 = vld [vmem:[#allocation24_spill] sm:$0xff] }
 0x235   : > { %v843_v46 = vadd.f32 %v839_v49, %v813_v19  ;;  %v852_v62 = vadd.f32 %v848_v4, %v822_v60  ;;  %v2002_v14 = vpop.permute.xlu1 %883  ;;  %v995_v49 = vadd.f32 %v991_v13, %v977_v51  ;;  %v994_v27 = vadd.f32 %v990_v2, %v976_v3 }
 0x236   : > { %v1993_v44 = vpop.permute.xlu0 %919  ;;  %v905_v26 = vmul.f32 %v1811_v36, %v2002_v14  ;;  %v1026_v51 = vmul.f32 %v1870_v61, %v1733_v31  ;;  %v965_v36 = vmul.f32 %v1805_v32, %v740_v63  ;;  %v974_v3 = vmul.f32 %v1807_v33, %v740_v63  ;;  %v2212_v63 = vld [vmem:[#allocation17_spill] sm:$0xff] }
 0x237   : > { %v873_v5 = vadd.f32 %v869_v57, %v843_v46  ;;  %v882_v42 = vadd.f32 %v878_v15, %v852_v62  ;;  %v929_v60 = vmul.f32 %v1798_v1, %v1993_v44  ;;  %v938_v6 = vmul.f32 %v1881_v0, %v1993_v44 }
 0x238   : > { %v896_v57 = vmul.f32 %v1775_v38, %v2002_v14  ;;  %v983_v46 = vmul.f32 %v1815_v29, %v1823_v55  ;;  %v992_v62 = vmul.f32 %v1817_v45, %v1823_v55  ;;  %v968_v38 = vadd.f32 %v1937_v7, %v950_v9 }
 0x239   : > { %v903_v4 = vadd.f32 %v899_v22, %v873_v5  ;;  %v912_v19 = vadd.f32 %v908_v12, %v882_v42  ;;  %v1013_v13 = vadd.f32 %v1009_v39, %v995_v49  ;;  %v2209_v22 = vld [vmem:[#allocation13_spill] sm:$0xff]  ;;  %v2210_v12 = vld [vmem:[#allocation14_spill] sm:$0xff]  ;;  %v909_v2 = vadd.f32 %v905_v26, %v879_v52 }
 0x23a   : > { %v900_v42 = vadd.f32 %v896_v57, %v870_v48  ;;  %v1012_v45 = vadd.f32 %v2211_v34, %v994_v27  ;;  %v1001_v39 = vmul.f32 %v2212_v63, %v1883_v8  ;;  %v1010_v9 = vmul.f32 %v1803_v30, %v1883_v8  ;;  %v2214_v27 = vld [vmem:[#allocation15_spill] sm:$0xff] }
 0x23b   : > { %v933_v16 = vadd.f32 %v929_v60, %v903_v4  ;;  %v942_v15 = vadd.f32 %v938_v6, %v912_v19  ;;  %v1031_v48 = vadd.f32 %v1027_v54, %v1013_v13  ;;  %v986_v52 = vadd.f32 %v982_v56, %v968_v38 }
 0x23c   : > { %v1028_v6 = vmul.f32 %v1870_v61, %v2203_v41  ;;  %v1030_v26 = vadd.f32 %v1026_v51, %v1012_v45  ;;  %v2216_v45 = vld [vmem:[#allocation21_spill] sm:$0xff] }
 0x23d   : > { %v951_v31 = vadd.f32 %v2209_v22, %v933_v16  ;;  %v960_v5 = vadd.f32 %v2210_v12, %v942_v15  ;;  %v2215_v15 = vld [vmem:[#allocation16_spill] sm:$0xff]  ;;  %v1018_v22 = vmul.f32 %v1868_v53, %v1831_v11 }
 0x23e   : > { %v2032_v29 = vpop.permute.xlu0 %913 }
 0x23f   : > { %v969_v55 = vadd.f32 %v965_v36, %v951_v31  ;;  %v978_v7 = vadd.f32 %v974_v3, %v960_v5  ;;  %v926_v32 = vmul.f32 %v1798_v1, %v2032_v29  ;;  %v935_v33 = vmul.f32 %v1881_v0, %v2032_v29  ;;  %v2213_v0 = vld [vmem:[#allocation22_spill] sm:$0xff] }
 0x240   : > { %v1000_v1 = vmul.f32 %v2212_v63, %v1729_v28  ;;  %v1045_v57 = vmul.f32 %v2213_v0, %v1746_v43  ;;  %v1046_v38 = vmul.f32 %v2213_v0, %v1944_v35  ;;  %v1064_v31 = vmul.f32 %v1825_v25, %v2207_v37 }
 0x241   : > { %v930_v49 = vadd.f32 %v926_v32, %v900_v42  ;;  %v939_v4 = vadd.f32 %v935_v33, %v909_v2  ;;  %v996_v19 = vadd.f32 %v992_v62, %v978_v7  ;;  %v987_v60 = vadd.f32 %v983_v46, %v969_v55  ;;  %v2217_v7 = vld [vmem:[#allocation20_spill] sm:$0xff] }
 0x242   : > { %v1044_v62 = vmul.f32 %v2213_v0, %v1721_v24  ;;  %v1019_v46 = vmul.f32 %v1868_v53, %v2203_v41  ;;  %v1004_v28 = vadd.f32 %v1000_v1, %v986_v52  ;;  %v1049_v3 = vadd.f32 %v1045_v57, %v1031_v48  ;;  %v2220_v52 = vld [vmem:[#allocation18_spill] sm:$0xff]  ;;  %v2222_v1 = vld [vmem:[#allocation11_spill] sm:$0xff] }
 0x243   : > { %v948_v16 = vadd.f32 %v2214_v27, %v930_v49  ;;  %v957_v30 = vadd.f32 %v2215_v15, %v939_v4  ;;  %v1014_v8 = vadd.f32 %v1010_v9, %v996_v19  ;;  %v1005_v56 = vadd.f32 %v1001_v39, %v987_v60 }
 0x244   : > { %v1063_v24 = vmul.f32 %v1825_v25, %v1719_v23  ;;  %v1048_v41 = vadd.f32 %v1044_v62, %v1030_v26  ;;  %v1037_v42 = vmul.f32 %v1864_v40, %v1944_v35  ;;  %v1082_v53 = vmul.f32 %v1996_v58, %v1993_v44  ;;  %v2219_v35 = vld [vmem:[#allocation25_spill] sm:$0xff] }
 0x245   : > { %v966_v13 = vadd.f32 %v1923_v20, %v948_v16  ;;  %v975_v51 = vadd.f32 %v1927_v50, %v957_v30  ;;  %v1032_v36 = vadd.f32 %v1028_v6, %v1014_v8  ;;  %v1023_v54 = vadd.f32 %v1019_v46, %v1005_v56  ;;  %v2223_v30 = vld [vmem:[#allocation6_spill] sm:$0xff] }
 0x246   : > { %v1025_v50 = vmul.f32 %v1870_v61, %v1713_v18  ;;  %v1022_v11 = vadd.f32 %v1018_v22, %v1004_v28  ;;  %v1067_v34 = vadd.f32 %v1063_v24, %v1049_v3  ;;  %v2218_v18 = vld [vmem:[#allocation23_spill] sm:$0xff]  ;;  %v1066_v33 = vadd.f32 %v2219_v35, %v1048_v41  ;;  %v2226_v3 = vld [vmem:[#allocation4_spill] sm:$0xff]  ;;  %v382_v41 = vld [vmem:[%s2153_s5 + $0x18] sm:$0xff] }
 0x247   : > { %v1050_v12 = vadd.f32 %v1046_v38, %v1032_v36  ;;  %v993_v5 = vadd.f32 %v1919_v21, %v975_v51  ;;  %v984_v20 = vadd.f32 %v1911_v59, %v966_v13  ;;  %v1043_v21 = vmul.f32 %v2213_v0, %v1711_v17  ;;  %v2221_v17 = vld [vmem:[#allocation19_spill] sm:$0xff]  ;;  %v2225_v36 = vld [vmem:[#allocation5_spill] sm:$0xff]  ;;  %v381_v24 = vld [vmem:[%s2153_s5 + $0x10] sm:$0xff] }
 0x248   : > { %v1036_v59 = vmul.f32 %v1864_v40, %v1746_v43  ;;  %v1081_v61 = vmul.f32 %v1996_v58, %v2218_v18  ;;  %v1041_v9 = vadd.f32 %v1037_v42, %v1023_v54  ;;  %v1080_v49 = vmul.f32 %v1996_v58, %v2220_v52  ;;  %v2227_v22 = vld [vmem:[#allocation3_spill] sm:$0xff]  ;;  %v1095_v42 = vpop.permute.xlu2 %1094 }
 0x249   : > { %v1068_v2 = vadd.f32 %v1064_v31, %v1050_v12  ;;  %v1011_v55 = vadd.f32 %v2216_v45, %v993_v5  ;;  %v1002_v32 = vadd.f32 %v2217_v7, %v984_v20  ;;  %v1061_v4 = vmul.f32 %v1825_v25, %v2002_v14  ;;  %v2228_v31 = vld [vmem:[#allocation2_spill] sm:$0xff]  ;;  %v1090_v12 = vpop.permute.xlu1 %1089 }
 0x24a   : > { %v1055_v19 = vmul.f32 %v2221_v17, %v2207_v37  ;;  %v1085_v43 = vadd.f32 %v1081_v61, %v1067_v34  ;;  %v1040_v60 = vadd.f32 %v1036_v59, %v1022_v11  ;;  %v1069_v0 = vperm.slane %v2222_v1, 0  ;;  %v1391_v20 = vld [vmem:[%s1478_s10] sm:$0xff] }
 0x24b   : > { %v1086_v63 = vadd.f32 %v1082_v53, %v1068_v2  ;;  %v1029_v39 = vadd.f32 %v1025_v50, %v1011_v55  ;;  %v1020_v48 = vadd.f32 %v1983_v47, %v1002_v32  ;;  %v1054_v47 = vmul.f32 %v2221_v17, %v1719_v23  ;;  %v2224_v23 = vld [vmem:[#allocation26_spill] sm:$0xff]  ;;  %v1392_v2 = vld [vmem:[%s1478_s10 + $0x8] sm:$0xff]  ;;  %v1100_v55 = vpop.permute.xlu0 %1099 }
 0x24c   : > { %v1084_v57 = vadd.f32 %v1080_v49, %v1066_v33  ;;  %v1079_v25 = vmul.f32 %v1996_v58, %v2032_v29  ;;  %v1059_v27 = vadd.f32 %v1055_v19, %v1041_v9  ;;  %v1073_v16 = vmul.f32 %v1069_v0, %v1993_v44 }
 0x24d   : > { %1123 = vmatpush.msra.mxu2 %v1086_v63  ;;  %v1047_v40 = vadd.f32 %v1043_v21, %v1029_v39  ;;  %v1038_v6 = vadd.f32 %v1971_v10, %v1020_v48  ;;  %v1058_v15 = vadd.f32 %v1054_v47, %v1040_v60  ;;  %v1053_v10 = vmul.f32 %v2221_v17, %v2223_v30  ;;  %v1393_v21 = vld [vmem:[%s1478_s10 + $0x10] sm:$0xff]  ;;  %v1394_v63 = vld [vmem:[%s1478_s10 + $0x18] sm:$0xff] }
 0x24e   : > { %v1077_v8 = vadd.f32 %v1073_v16, %v1059_v27  ;;  %v1072_v56 = vmul.f32 %v1069_v0, %v2218_v18  ;;  %v1052_v46 = vmul.f32 %v2221_v17, %v2002_v14  ;;  %v1071_v38 = vmul.f32 %v1069_v0, %v2220_v52  ;;  %v379_v14 = vld [vmem:[%s2153_s5] sm:$0xff] }
 0x24f   : > { %1124 = vmatpush.msra.mxu2 %v1085_v43  ;;  %v1065_v26 = vadd.f32 %v1061_v4, %v1047_v40  ;;  %v1057_v62 = vadd.f32 %v1053_v10, %v2224_v23  ;;  %v1070_v13 = vmul.f32 %v1069_v0, %v2032_v29  ;;  %v380_v29 = vld [vmem:[%s2153_s5 + $0x8] sm:$0xff] }
 0x250   : > { %v1076_v58 = vadd.f32 %v1072_v56, %v1058_v15  ;;  %v1056_v28 = vadd.f32 %v1052_v46, %v1038_v6 }
 0x251   : > { %1125 = vmatpush.msra.mxu2 %v1084_v57  ;;  %v1083_v37 = vadd.f32 %v1079_v25, %v1065_v26  ;;  %v1075_v44 = vadd.f32 %v1071_v38, %v1057_v62  ;;  %v1105_v61 = vpop.permute.xlu1 %1104 }
 0x252   : > { %v1074_v51 = vadd.f32 %v1070_v13, %v1056_v28 }
 0x253   : > { %1126 = vmatpush.msra.mxu2 %v1083_v37 }
 0x255   : > { %1127 = vmatpush.msra.mxu2 %v1077_v8 }
 0x257   : > { %1128 = vmatpush.msra.mxu2 %v1076_v58 }
 0x259   : > { %1129 = vmatpush.msra.mxu2 %v1075_v44 }
 0x25b   : > { %1130 = vmatpush.msra.mxu2 %v1074_v51 }
 0x25d   : > { %1131 = vmatpush.msra.mxu2 %v2225_v36 }
 0x25f   : > { %1132 = vmatpush.msra.mxu2 %v2226_v3 }
 0x261   : > { %1133 = vmatpush.msra.mxu2 %v2227_v22 }
 0x263   : > { %1134 = vmatpush.msra.mxu2 %v2228_v31 }
 0x264   : > { %1316 = vmatmul.msk.f32.vlgmr.msra.gmra.mxu2 %vm538_vm0, %v379_v14 }
 0x26c   : > { %1317 = vmatmul.msk.f32.gmra.mxu2 %vm538_vm0, %v380_v29 }
 0x274   : > { %1318 = vmatmul.msk.f32.gmra.mxu2 %vm538_vm0, %v381_v24 }
 0x27c   : > { %1319 = vmatmul.msk.f32.gmra.mxu2 %vm538_vm0, %v382_v41  ;;  %vm441_vm0 = vcmask 7168  }
 0x2e7   : > { %v1136_v5 = vpop.f32.mrf.mxu2 }
 0x2e8   : > { %v1137_v54 = vadd.f32 %v1136_v5, %v1090_v12 }
 0x2ea   : > { %v1148_v50 = vadd.f32 %v1391_v20, %v1137_v54 }
 0x2ec   : > { %1152 = vst [vmem:[%s333_s24] sm:$0xff] %v1148_v50  ;;  %1156 = vadd.xlane.f32.xlu2 %v1148_v50  ;;  %v1168_v45 = vmul.f32 %v1148_v50, %v1148_v50 }
 0x2ef   : > { %v1139_v53 = vpop.f32.mrf.mxu2 }
 0x2f0   : > { %v1140_v11 = vadd.f32 %v1139_v53, %v1095_v42 }
 0x2f2   : > { %v1149_v34 = vadd.f32 %v1392_v2, %v1140_v11 }
 0x2f4   : > { %1153 = vst [vmem:[%s333_s24 + $0x8] sm:$0xff] %v1149_v34  ;;  %1158 = vadd.xlane.f32.xlu0 %v1149_v34  ;;  %1172 = vadd.xlane.f32.xlu2 %v1168_v45  ;;  %v1169_v18 = vmul.f32 %v1149_v34, %v1149_v34 }
 0x2f7   : > { %v1142_v7 = vpop.f32.mrf.mxu2 }
 0x2f8   : > { %v1143_v32 = vadd.f32 %v1142_v7, %v1100_v55 }
 0x2fa   : > { %v1150_v59 = vadd.f32 %v1393_v21, %v1143_v32 }
 0x2fc   : > { %1154 = vst [vmem:[%s333_s24 + $0x10] sm:$0xff] %v1150_v59  ;;  %1160 = vadd.xlane.f32.xlu1 %v1150_v59  ;;  %1174 = vadd.xlane.f32.xlu0 %v1169_v18  ;;  %v1170_v9 = vmul.f32 %v1150_v59, %v1150_v59 }
 0x2ff   : > { %v1145_v35 = vpop.f32.mrf.mxu2 }
 0x300   : > { %v1146_v33 = vadd.f32 %v1145_v35, %v1105_v61 }
 0x302   : > { %v1151_v39 = vadd.f32 %v1394_v63, %v1146_v33 }
 0x304   : > { %1155 = vst [vmem:[%s333_s24 + $0x18] sm:$0xff] %v1151_v39  ;;  %1176 = vadd.xlane.f32.xlu1 %v1170_v9  ;;  %1162 = vadd.xlane.f32.xlu2 %v1151_v39  ;;  %v1171_v48 = vmul.f32 %v1151_v39, %v1151_v39 }
 0x30c   : > { %1178 = vadd.xlane.f32.xlu2 %v1171_v48 }
 0x35f   : > { %v1157_v52 = vpop.xlane.xlu2 %1156 }
 0x360   : > { %1184 = vst.msk [vmem:[%s338_s30] sm:$0xff] %vm441_vm0, %v1157_v52 }
 0x367   : > { %v1159_v49 = vpop.xlane.xlu0 %1158  ;;  %v1173_v4 = vpop.xlane.xlu2 %1172 }
 0x368   : > { %1185 = vst.msk [vmem:[%s338_s30 + $0x8] sm:$0xff] %vm441_vm0, %v1159_v49 }
 0x369   : > { %1188 = vst.msk [vmem:[%s338_s30 + $0x20] sm:$0xff] %vm441_vm0, %v1173_v4 }
 0x36f   : > { %v1161_v17 = vpop.xlane.xlu1 %1160  ;;  %v1175_v19 = vpop.xlane.xlu0 %1174 }
 0x370   : > { %1186 = vst.msk [vmem:[%s338_s30 + $0x10] sm:$0xff] %vm441_vm0, %v1161_v17 }
 0x371   : > { %1189 = vst.msk [vmem:[%s338_s30 + $0x28] sm:$0xff] %vm441_vm0, %v1175_v19 }
 0x377   : > { %v1177_v43 = vpop.xlane.xlu1 %1176  ;;  %v1163_v40 = vpop.xlane.xlu2 %1162 }
 0x378   : > { %1190 = vst.msk [vmem:[%s338_s30 + $0x30] sm:$0xff] %vm441_vm0, %v1177_v43 }
 0x379   : > { %1187 = vst.msk [vmem:[%s338_s30 + $0x18] sm:$0xff] %vm441_vm0, %v1163_v40 }
 0x37f   : > { %v1179_v60 = vpop.xlane.xlu2 %1178 }
 0x380   : > { %1191 = vst.msk [vmem:[%s338_s30 + $0x38] sm:$0xff] %vm441_vm0, %v1179_v60 }
 0x381 PF: > { %s19_s27 = sadd.s32 1, %s1401_s27  }
 0x382   : > { %p16_p4 = scmp.ge.s32.totalorder %s19_s27, 4  }
 0x384   :  { %18 = sbr.rel (!%p16_p4) target bundleno = 1 (0x1), region = 93 }

</bundles_post_ra>
